<compile_context>
chip_gen: v7x
topology: tpu7x:2x2x1
jax: 0.10.0
libtpu: 0.0.40
codegen_flags: <defaults>
</compile_context>

<pallas_src>
import functools
import math

import jax
import jax.numpy as jnp
from jax.experimental import pallas as pl
from jax.experimental.pallas import tpu as pltpu


def _round_up(v, m):
    return ((v + m - 1) // m) * m


# ----------------------------------------------------------------------------
# Pallas kernel: one KANLayer forward (per batch tile, transposed layout)
# ----------------------------------------------------------------------------
def _kan_layer_kernel(x_ref, g_ref, inv_ref, wb_ref, wsp_ref, o_ref, stack_ref, *,
                      sp_order, ngrid, nb, inc_sub, scale_base, scale_spline):
    x = x_ref[...]                                    # (inc_sub, TB) f32, batch on lanes

    def gcol(j):                                      # knot j per feature -> (inc_sub, 1)
        return g_ref[j * inc_sub:(j + 1) * inc_sub, :]

    def ivcol(k, j):                                  # 1/(g[j+k]-g[j])    -> (inc_sub, 1)
        r = ((k - 1) * ngrid + j) * inc_sub
        return inv_ref[r:r + inc_sub, :]

    # order-0 bases: one compare per knot, and-not per interval
    ge = [(x >= gcol(j)).astype(jnp.float32) for j in range(ngrid)]
    bases = [ge[j] * (1.0 - ge[j + 1]) for j in range(ngrid - 1)]

    # Cox–de Boor recursion (static unroll); divides replaced by precomputed
    # reciprocals; the (inc_sub, 1) columns lane-broadcast inside the VPU ops
    # and are loaded at use-site to keep the live vreg set small.
    for k in range(1, sp_order + 1):
        nxt = []
        for j in range(ngrid - 1 - k):
            left = (x - gcol(j)) * ivcol(k, j)
            right = (gcol(j + k + 1) - x) * ivcol(k, j + 1)
            nxt.append(bases[j] * left + bases[j + 1] * right)
        bases = nxt                                   # final length == nb

    # stage final bases sublane-contiguously: (nb*inc_sub, TB), K packed tight
    for j in range(nb):
        stack_ref[j * inc_sub:(j + 1) * inc_sub, :] = bases[j]

    # fused spline contraction (transposed): (ouc_pad, K) @ (K, TB), f32 acc
    spline_y = jnp.dot(wsp_ref[...], stack_ref[...].astype(jnp.bfloat16),
                       preferred_element_type=jnp.float32)

    # base path: SiLU(W_base @ x)  (activation AFTER the linear, per the spec)
    z = jnp.dot(wb_ref[...], x, preferred_element_type=jnp.float32)
    base_y = z * jax.nn.sigmoid(z)

    o_ref[...] = (scale_base * base_y + scale_spline * spline_y).astype(o_ref.dtype)


# ----------------------------------------------------------------------------
# Weight / grid packing into the kernel's resident layouts (cacheable)
# ----------------------------------------------------------------------------
def pack_kan_layer(grid, w_base, sp_weight, sp_scale, *, sp_order):
    ouc, inc = w_base.shape
    nb = sp_weight.shape[-1]
    ngrid = grid.shape[1]
    inc_sub = _round_up(inc, 8)
    ouc_pad = _round_up(ouc, 128)

    # per-feature knots; padded features replicate a valid increasing knot vector
    grid_p = jnp.pad(grid.astype(jnp.float32),
                     ((0, inc_sub - inc), (0, 0)), mode='edge')     # (inc_sub, ngrid)
    g_col = grid_p.T.reshape(ngrid * inc_sub, 1)                    # row j*inc_sub + c

    # grid-only reciprocals inv[k-1,j] = 1/(g[j+k]-g[j]); zero-width intervals -> 0
    inv_blocks = []
    for k in range(1, sp_order + 1):
        diff = grid_p[:, k:] - grid_p[:, :-k]                       # (inc_sub, ngrid-k)
        safe = jnp.where(diff != 0, diff, 1.0)
        inv_blocks.append(jnp.pad(jnp.where(diff != 0, 1.0 / safe, 0.0),
                                  ((0, 0), (0, k))))                # -> (inc_sub, ngrid)
    inv_col = jnp.concatenate(inv_blocks, axis=1).T.reshape(
        sp_order * ngrid * inc_sub, 1)                  # row ((k-1)*ngrid+j)*inc_sub + c

    # base weight (f32) and fused spline weight (bf16), padded & pre-flattened
    wb = jnp.pad(w_base.astype(jnp.float32),
                 ((0, ouc_pad - ouc), (0, inc_sub - inc)))          # (ouc_pad, inc_sub)
    scaled = (sp_weight * sp_scale[:, :, None]).astype(jnp.float32) # (ouc, inc, nb)
    wsp = jnp.transpose(scaled, (0, 2, 1))                          # (ouc, nb, inc)
    wsp = jnp.pad(wsp, ((0, ouc_pad - ouc), (0, 0), (0, inc_sub - inc)))
    wsp = wsp.reshape(ouc_pad, nb * inc_sub).astype(jnp.bfloat16)   # (ouc_pad, K)

    return dict(g_col=g_col, inv_col=inv_col, wb=wb, wsp=wsp, inc=inc, ouc=ouc,
                nb=nb, ngrid=ngrid, inc_sub=inc_sub, ouc_pad=ouc_pad)


def kan_layer_forward(x, grid, w_base, sp_weight, sp_scale, *, sp_order,
                      scale_base=1.0, scale_spline=1.0, block_b=256, packed=None):
    """One KANLayer forward; hot path runs in a single Pallas TPU kernel."""
    if packed is None:
        packed = pack_kan_layer(grid, w_base, sp_weight, sp_scale, sp_order=sp_order)
    B = x.shape[0]
    inc, ouc = packed["inc"], packed["ouc"]
    nb, ngrid = packed["nb"], packed["ngrid"]
    inc_sub, ouc_pad = packed["inc_sub"], packed["ouc_pad"]
    K = nb * inc_sub

    # batch is the lane dim of every tile -> tile in multiples of 128
    TB = max(128, _round_up(min(block_b, _round_up(B, 128)), 128))
    B_pad = _round_up(B, TB)
    # x transposed: features on sublanes (pad to 8), batch on lanes (pad to TB)
    x_t = jnp.pad(x.astype(jnp.float32).T,
                  ((0, inc_sub - inc), (0, B_pad - B)))             # (inc_sub, B_pad)

    const_bytes = (packed["g_col"].size + packed["inv_col"].size
                   + packed["wb"].size) * 4 + packed["wsp"].size * 2
    tile_bytes = (inc_sub + ouc_pad) * TB * 4 + K * TB * 4
    vmem_limit = int(min(96 * 2 ** 20, max(32 * 2 ** 20, 2 * (const_bytes + tile_bytes))))

    kernel = functools.partial(_kan_layer_kernel, sp_order=sp_order, ngrid=ngrid,
                               nb=nb, inc_sub=inc_sub,
                               scale_base=scale_base, scale_spline=scale_spline)
    out_t = pl.pallas_call(
        kernel,
        out_shape=jax.ShapeDtypeStruct((ouc_pad, B_pad), jnp.float32),
        grid=(B_pad // TB,),
        in_specs=[
            pl.BlockSpec((inc_sub, TB), lambda i: (0, i)),                   # x tile
            pl.BlockSpec((ngrid * inc_sub, 1), lambda i: (0, 0)),            # knot cols
            pl.BlockSpec((sp_order * ngrid * inc_sub, 1), lambda i: (0, 0)), # recip cols
            pl.BlockSpec((ouc_pad, inc_sub), lambda i: (0, 0)),              # base weight
            pl.BlockSpec((ouc_pad, K), lambda i: (0, 0)),                    # spline weight
        ],
        out_specs=pl.BlockSpec((ouc_pad, TB), lambda i: (0, i)),
        scratch_shapes=[pltpu.VMEM((K, TB), jnp.float32)],
        compiler_params=pltpu.CompilerParams(
            dimension_semantics=("parallel",),
            vmem_limit_bytes=vmem_limit),
    )(x_t, packed["g_col"], packed["inv_col"], packed["wb"], packed["wsp"])
    return out_t[:ouc, :B].T.astype(x.dtype)           # un-transpose / un-pad (XLA)


# ----------------------------------------------------------------------------
# Plain-JAX glue: B-spline reference, least-squares fit, grid update, init
# ----------------------------------------------------------------------------
def b_spline(x, grid, sp_order):
    """x: (N, inc), grid: (inc, ngrid) -> (N, inc, grid_size + sp_order)."""
    xg = x[..., None]
    bases = ((xg >= grid[:, :-1]) & (xg < grid[:, 1:])).astype(x.dtype)
    for k in range(1, sp_order + 1):
        bases = (bases[..., :-1] * (xg - grid[:, :-(k + 1)])
                 / (grid[:, k:-1] - grid[:, :-(k + 1)])
                 + bases[..., 1:] * (grid[:, k + 1:] - xg)
                 / (grid[:, k + 1:] - grid[:, 1:-k]))
    return bases


def curve2coeff(x, y, grid, sp_order):
    """x: (N, inc), y: (N, inc, ouc) -> (ouc, inc, grid_size + sp_order)."""
    # TODO(synk): torch.linalg.lstsq has no Pallas equivalent; the minimum-norm
    # least-squares solve is done in plain JAX via batched pinv (SVD).
    A = jnp.transpose(b_spline(x, grid, sp_order), (1, 0, 2))   # (inc, N, nb)
    B = jnp.transpose(y, (1, 0, 2))                             # (inc, N, ouc)
    sol = jnp.matmul(jnp.linalg.pinv(A), B)                     # (inc, nb, ouc)
    return jnp.transpose(sol, (2, 0, 1))                        # (ouc, inc, nb)


def update_grid(x, grid, sp_weight, sp_scale, *, grid_size, sp_order,
                grid_eps, margin=0.01):
    """Reproduces KANLayer.update_grid; returns (new_grid, new_sp_weight)."""
    # TODO(synk): data-dependent sort/quantile knot placement is parameter
    # setup, not the hot path -> plain JAX.
    batch, _ = x.shape
    splines = jnp.transpose(b_spline(x, grid, sp_order), (1, 0, 2))   # (inc, B, nb)
    scaled = sp_weight * sp_scale[:, :, None]                         # (ouc, inc, nb)
    ori_coef = jnp.transpose(scaled, (1, 2, 0))                       # (inc, nb, ouc)
    last_out = jnp.transpose(jnp.matmul(splines, ori_coef), (1, 0, 2))  # (B, inc, ouc)

    x_sorted = jnp.sort(x, axis=0)
    idx = jnp.linspace(0.0, batch - 1, grid_size + 1).astype(jnp.int32)
    grid_main = x_sorted[idx]                                         # (G+1, inc)
    adjust_step = (x_sorted[-1] - x_sorted[0] + 2 * margin) / grid_size
    grid_adjust = (jnp.arange(grid_size + 1, dtype=x.dtype)[:, None] * adjust_step
                   + x_sorted[0] - margin)
    g = grid_eps * grid_adjust + (1.0 - grid_eps) * grid_main         # (G+1, inc)

    left = g[0] - jnp.einsum('i,j->ji', adjust_step,
                             jnp.arange(sp_order, 0, -1, dtype=x.dtype))
    right = g[-1] + jnp.einsum('i,j->ji', adjust_step,
                               jnp.arange(1, sp_order + 1, dtype=x.dtype))
    new_grid = jnp.concatenate([left, g, right], axis=0).T            # (inc, ngrid)

    new_sp_weight = curve2coeff(x, last_out, new_grid, sp_order)
    return new_grid, new_sp_weight


def init_kan_layer(key, inc, ouc, grid_size, sp_order, scale_noise, grid_range):
    ngrid = grid_size + 1 + 2 * sp_order
    grid = jnp.tile(jnp.linspace(grid_range[0], grid_range[1], ngrid,
                                 dtype=jnp.float32)[None, :], (inc, 1))   # (inc, ngrid)
    k1, k2, k3 = jax.random.split(key, 3)
    noise = (jax.random.uniform(k1, (grid_size + 1, inc, ouc), jnp.float32) - 0.5) \
        * scale_noise / grid_size
    sp_weight = curve2coeff(grid.T[sp_order:-sp_order], noise, grid, sp_order)
    # kaiming_uniform_ (default a=0) on (ouc, inc): bound = sqrt(2)*sqrt(3/fan_in)
    bnd_scale = math.sqrt(2.0) * math.sqrt(3.0 / inc)
    sp_scale = jax.random.uniform(k2, (ouc, inc), jnp.float32, -bnd_scale, bnd_scale)
    # nn.Linear default init: bound = 1/sqrt(fan_in)
    bnd_base = 1.0 / math.sqrt(inc)
    w_base = jax.random.uniform(k3, (ouc, inc), jnp.float32, -bnd_base, bnd_base)
    return dict(grid=grid, sp_weight=sp_weight, sp_scale=sp_scale, w_base=w_base)


# ----------------------------------------------------------------------------
# KAN forward (grid update + Pallas layer forward per layer)
# ----------------------------------------------------------------------------
def kan_forward(x, layer_params, *, grid_size, sp_order, grid_eps,
                scale_base=1.0, scale_spline=1.0, layer_fn=kan_layer_forward):
    for p in layer_params:
        new_grid, new_spw = update_grid(x, p["grid"], p["sp_weight"], p["sp_scale"],
                                        grid_size=grid_size, sp_order=sp_order,
                                        grid_eps=grid_eps)
        x = layer_fn(x, new_grid, p["w_base"], new_spw, p["sp_scale"],
                     sp_order=sp_order, scale_base=scale_base,
                     scale_spline=scale_spline)
    return x


# pure-JAX reference for the Pallas layer (used only for a sanity check)
def kan_layer_forward_ref(x, grid, w_base, sp_weight, sp_scale, *,
                          sp_order, scale_base=1.0, scale_spline=1.0):
    z = jnp.dot(x, w_base.T, precision=jax.lax.Precision.HIGHEST)
    base_y = z * jax.nn.sigmoid(z)
    bases = b_spline(x, grid, sp_order)                       # (B, inc, nb)
    scaled = sp_weight * sp_scale[:, :, None]                 # (ouc, inc, nb)
    spline_y = jnp.dot(bases.reshape(x.shape[0], -1),
                       scaled.reshape(scaled.shape[0], -1).T,
                       precision=jax.lax.Precision.HIGHEST)
    return scale_base * base_y + scale_spline * spline_y


if __name__ == "__main__":
    layers_hidden = [4, 32, 8]
    grid_size, sp_order = 5, 3
    grid_eps, scale_noise = 0.02, 0.1
    batch = 16

    key = jax.random.PRNGKey(0)
    keys = jax.random.split(key, len(layers_hidden))
    x = jax.random.normal(keys[0], (batch, layers_hidden[0]), dtype=jnp.float32)

    params = [init_kan_layer(k, i, o, grid_size, sp_order, scale_noise, (-1.0, 1.0))
              for k, i, o in zip(keys[1:], layers_hidden[:-1], layers_hidden[1:])]

    out = kan_forward(x, params, grid_size=grid_size, sp_order=sp_order,
                      grid_eps=grid_eps)
    out = jax.block_until_ready(out)

    ref = jax.block_until_ready(
        kan_forward(x, params, grid_size=grid_size, sp_order=sp_order,
                    grid_eps=grid_eps, layer_fn=kan_layer_forward_ref))

    assert out.shape == (batch, layers_hidden[-1])
    assert bool(jnp.all(jnp.isfinite(out)))
    # tolerance allows for bf16 spline-matmul operands (f32 accumulation) vs f32 ref
    assert bool(jnp.allclose(out, ref, rtol=2e-2, atol=2e-2)), "Pallas vs JAX mismatch"
    print("KERNEL_OK")
</pallas_src>

<mosaic_0001>
module attributes {stable_mosaic.version = 11 : i64} {
  func.func @_kan_layer_kernel(%arg0: i32, %arg1: memref<8x128xf32, #tpu.memory_space<vmem>>, %arg2: memref<96x1xf32, #tpu.memory_space<vmem>>, %arg3: memref<288x1xf32, #tpu.memory_space<vmem>>, %arg4: memref<128x8xf32, #tpu.memory_space<vmem>>, %arg5: memref<128x64xbf16, #tpu.memory_space<vmem>>, %arg6: memref<128x128xf32, #tpu.memory_space<vmem>>, %arg7: memref<64x128xf32, #tpu.memory_space<vmem>>) attributes {dimension_semantics = [#tpu.dimension_semantics<parallel>], iteration_bounds = array<i64: 1>, scalar_prefetch = 0 : i64, scratch_operands = 1 : i64, tpu.core_type = #tpu.core_type<tc>, window_params = [{transform_indices = @transform_0, window_bounds = array<i64: 8, 128>}, {pipeline_mode = #tpu.pipeline_mode<synchronous>, transform_indices = @transform_1, window_bounds = array<i64: 96, 1>}, {pipeline_mode = #tpu.pipeline_mode<synchronous>, transform_indices = @transform_2, window_bounds = array<i64: 288, 1>}, {pipeline_mode = #tpu.pipeline_mode<synchronous>, transform_indices = @transform_3, window_bounds = array<i64: 128, 8>}, {pipeline_mode = #tpu.pipeline_mode<synchronous>, transform_indices = @transform_4, window_bounds = array<i64: 128, 64>}, {transform_indices = @transform_5, window_bounds = array<i64: 128, 128>}]} {
    %c0 = arith.constant 0 : index
    %c0_0 = arith.constant 0 : index
    %0 = vector.load %arg1[%c0, %c0_0] : memref<8x128xf32, #tpu.memory_space<vmem>>, vector<8x128xf32>
    %c0_1 = arith.constant 0 : index
    %c0_2 = arith.constant 0 : index
    %1 = vector.load %arg2[%c0_1, %c0_2] : memref<96x1xf32, #tpu.memory_space<vmem>>, vector<8x1xf32>
    %2 = vector.broadcast %1 : vector<8x1xf32> to vector<8x128xf32>
    %3 = arith.cmpf oge, %0, %2 : vector<8x128xf32>
    %4 = arith.extui %3 : vector<8x128xi1> to vector<8x128xi32>
    %5 = arith.sitofp %4 : vector<8x128xi32> to vector<8x128xf32>
    %c8 = arith.constant 8 : index
    %c0_3 = arith.constant 0 : index
    %6 = vector.load %arg2[%c8, %c0_3] : memref<96x1xf32, #tpu.memory_space<vmem>>, vector<8x1xf32>
    %7 = vector.broadcast %6 : vector<8x1xf32> to vector<8x128xf32>
    %8 = arith.cmpf oge, %0, %7 : vector<8x128xf32>
    %9 = arith.extui %8 : vector<8x128xi1> to vector<8x128xi32>
    %10 = arith.sitofp %9 : vector<8x128xi32> to vector<8x128xf32>
    %c16 = arith.constant 16 : index
    %c0_4 = arith.constant 0 : index
    %11 = vector.load %arg2[%c16, %c0_4] : memref<96x1xf32, #tpu.memory_space<vmem>>, vector<8x1xf32>
    %12 = vector.broadcast %11 : vector<8x1xf32> to vector<8x128xf32>
    %13 = arith.cmpf oge, %0, %12 : vector<8x128xf32>
    %14 = arith.extui %13 : vector<8x128xi1> to vector<8x128xi32>
    %15 = arith.sitofp %14 : vector<8x128xi32> to vector<8x128xf32>
    %c24 = arith.constant 24 : index
    %c0_5 = arith.constant 0 : index
    %16 = vector.load %arg2[%c24, %c0_5] : memref<96x1xf32, #tpu.memory_space<vmem>>, vector<8x1xf32>
    %17 = vector.broadcast %16 : vector<8x1xf32> to vector<8x128xf32>
    %18 = arith.cmpf oge, %0, %17 : vector<8x128xf32>
    %19 = arith.extui %18 : vector<8x128xi1> to vector<8x128xi32>
    %20 = arith.sitofp %19 : vector<8x128xi32> to vector<8x128xf32>
    %c32 = arith.constant 32 : index
    %c0_6 = arith.constant 0 : index
    %21 = vector.load %arg2[%c32, %c0_6] : memref<96x1xf32, #tpu.memory_space<vmem>>, vector<8x1xf32>
    %22 = vector.broadcast %21 : vector<8x1xf32> to vector<8x128xf32>
    %23 = arith.cmpf oge, %0, %22 : vector<8x128xf32>
    %24 = arith.extui %23 : vector<8x128xi1> to vector<8x128xi32>
    %25 = arith.sitofp %24 : vector<8x128xi32> to vector<8x128xf32>
    %c40 = arith.constant 40 : index
    %c0_7 = arith.constant 0 : index
    %26 = vector.load %arg2[%c40, %c0_7] : memref<96x1xf32, #tpu.memory_space<vmem>>, vector<8x1xf32>
    %27 = vector.broadcast %26 : vector<8x1xf32> to vector<8x128xf32>
    %28 = arith.cmpf oge, %0, %27 : vector<8x128xf32>
    %29 = arith.extui %28 : vector<8x128xi1> to vector<8x128xi32>
    %30 = arith.sitofp %29 : vector<8x128xi32> to vector<8x128xf32>
    %c48 = arith.constant 48 : index
    %c0_8 = arith.constant 0 : index
    %31 = vector.load %arg2[%c48, %c0_8] : memref<96x1xf32, #tpu.memory_space<vmem>>, vector<8x1xf32>
    %32 = vector.broadcast %31 : vector<8x1xf32> to vector<8x128xf32>
    %33 = arith.cmpf oge, %0, %32 : vector<8x128xf32>
    %34 = arith.extui %33 : vector<8x128xi1> to vector<8x128xi32>
    %35 = arith.sitofp %34 : vector<8x128xi32> to vector<8x128xf32>
    %c56 = arith.constant 56 : index
    %c0_9 = arith.constant 0 : index
    %36 = vector.load %arg2[%c56, %c0_9] : memref<96x1xf32, #tpu.memory_space<vmem>>, vector<8x1xf32>
    %37 = vector.broadcast %36 : vector<8x1xf32> to vector<8x128xf32>
    %38 = arith.cmpf oge, %0, %37 : vector<8x128xf32>
    %39 = arith.extui %38 : vector<8x128xi1> to vector<8x128xi32>
    %40 = arith.sitofp %39 : vector<8x128xi32> to vector<8x128xf32>
    %c64 = arith.constant 64 : index
    %c0_10 = arith.constant 0 : index
    %41 = vector.load %arg2[%c64, %c0_10] : memref<96x1xf32, #tpu.memory_space<vmem>>, vector<8x1xf32>
    %42 = vector.broadcast %41 : vector<8x1xf32> to vector<8x128xf32>
    %43 = arith.cmpf oge, %0, %42 : vector<8x128xf32>
    %44 = arith.extui %43 : vector<8x128xi1> to vector<8x128xi32>
    %45 = arith.sitofp %44 : vector<8x128xi32> to vector<8x128xf32>
    %c72 = arith.constant 72 : index
    %c0_11 = arith.constant 0 : index
    %46 = vector.load %arg2[%c72, %c0_11] : memref<96x1xf32, #tpu.memory_space<vmem>>, vector<8x1xf32>
    %47 = vector.broadcast %46 : vector<8x1xf32> to vector<8x128xf32>
    %48 = arith.cmpf oge, %0, %47 : vector<8x128xf32>
    %49 = arith.extui %48 : vector<8x128xi1> to vector<8x128xi32>
    %50 = arith.sitofp %49 : vector<8x128xi32> to vector<8x128xf32>
    %c80 = arith.constant 80 : index
    %c0_12 = arith.constant 0 : index
    %51 = vector.load %arg2[%c80, %c0_12] : memref<96x1xf32, #tpu.memory_space<vmem>>, vector<8x1xf32>
    %52 = vector.broadcast %51 : vector<8x1xf32> to vector<8x128xf32>
    %53 = arith.cmpf oge, %0, %52 : vector<8x128xf32>
    %54 = arith.extui %53 : vector<8x128xi1> to vector<8x128xi32>
    %55 = arith.sitofp %54 : vector<8x128xi32> to vector<8x128xf32>
    %c88 = arith.constant 88 : index
    %c0_13 = arith.constant 0 : index
    %56 = vector.load %arg2[%c88, %c0_13] : memref<96x1xf32, #tpu.memory_space<vmem>>, vector<8x1xf32>
    %57 = vector.broadcast %56 : vector<8x1xf32> to vector<8x128xf32>
    %58 = arith.cmpf oge, %0, %57 : vector<8x128xf32>
    %59 = arith.extui %58 : vector<8x128xi1> to vector<8x128xi32>
    %60 = arith.sitofp %59 : vector<8x128xi32> to vector<8x128xf32>
    %cst = arith.constant 1.000000e+00 : f32
    %61 = vector.broadcast %cst : f32 to vector<8x128xf32>
    %62 = arith.subf %61, %10 : vector<8x128xf32>
    %63 = arith.mulf %5, %62 : vector<8x128xf32>
    %cst_14 = arith.constant 1.000000e+00 : f32
    %64 = vector.broadcast %cst_14 : f32 to vector<8x128xf32>
    %65 = arith.subf %64, %15 : vector<8x128xf32>
    %66 = arith.mulf %10, %65 : vector<8x128xf32>
    %cst_15 = arith.constant 1.000000e+00 : f32
    %67 = vector.broadcast %cst_15 : f32 to vector<8x128xf32>
    %68 = arith.subf %67, %20 : vector<8x128xf32>
    %69 = arith.mulf %15, %68 : vector<8x128xf32>
    %cst_16 = arith.constant 1.000000e+00 : f32
    %70 = vector.broadcast %cst_16 : f32 to vector<8x128xf32>
    %71 = arith.subf %70, %25 : vector<8x128xf32>
    %72 = arith.mulf %20, %71 : vector<8x128xf32>
    %cst_17 = arith.constant 1.000000e+00 : f32
    %73 = vector.broadcast %cst_17 : f32 to vector<8x128xf32>
    %74 = arith.subf %73, %30 : vector<8x128xf32>
    %75 = arith.mulf %25, %74 : vector<8x128xf32>
    %cst_18 = arith.constant 1.000000e+00 : f32
    %76 = vector.broadcast %cst_18 : f32 to vector<8x128xf32>
    %77 = arith.subf %76, %35 : vector<8x128xf32>
    %78 = arith.mulf %30, %77 : vector<8x128xf32>
    %cst_19 = arith.constant 1.000000e+00 : f32
    %79 = vector.broadcast %cst_19 : f32 to vector<8x128xf32>
    %80 = arith.subf %79, %40 : vector<8x128xf32>
    %81 = arith.mulf %35, %80 : vector<8x128xf32>
    %cst_20 = arith.constant 1.000000e+00 : f32
    %82 = vector.broadcast %cst_20 : f32 to vector<8x128xf32>
    %83 = arith.subf %82, %45 : vector<8x128xf32>
    %84 = arith.mulf %40, %83 : vector<8x128xf32>
    %cst_21 = arith.constant 1.000000e+00 : f32
    %85 = vector.broadcast %cst_21 : f32 to vector<8x128xf32>
    %86 = arith.subf %85, %50 : vector<8x128xf32>
    %87 = arith.mulf %45, %86 : vector<8x128xf32>
    %cst_22 = arith.constant 1.000000e+00 : f32
    %88 = vector.broadcast %cst_22 : f32 to vector<8x128xf32>
    %89 = arith.subf %88, %55 : vector<8x128xf32>
    %90 = arith.mulf %50, %89 : vector<8x128xf32>
    %cst_23 = arith.constant 1.000000e+00 : f32
    %91 = vector.broadcast %cst_23 : f32 to vector<8x128xf32>
    %92 = arith.subf %91, %60 : vector<8x128xf32>
    %93 = arith.mulf %55, %92 : vector<8x128xf32>
    %c0_24 = arith.constant 0 : index
    %c0_25 = arith.constant 0 : index
    %94 = vector.load %arg2[%c0_24, %c0_25] : memref<96x1xf32, #tpu.memory_space<vmem>>, vector<8x1xf32>
    %95 = vector.broadcast %94 : vector<8x1xf32> to vector<8x128xf32>
    %96 = arith.subf %0, %95 : vector<8x128xf32>
    %c0_26 = arith.constant 0 : index
    %c0_27 = arith.constant 0 : index
    %97 = vector.load %arg3[%c0_26, %c0_27] : memref<288x1xf32, #tpu.memory_space<vmem>>, vector<8x1xf32>
    %98 = vector.broadcast %97 : vector<8x1xf32> to vector<8x128xf32>
    %99 = arith.mulf %96, %98 : vector<8x128xf32>
    %c16_28 = arith.constant 16 : index
    %c0_29 = arith.constant 0 : index
    %100 = vector.load %arg2[%c16_28, %c0_29] : memref<96x1xf32, #tpu.memory_space<vmem>>, vector<8x1xf32>
    %101 = vector.broadcast %100 : vector<8x1xf32> to vector<8x128xf32>
    %102 = arith.subf %101, %0 : vector<8x128xf32>
    %c8_30 = arith.constant 8 : index
    %c0_31 = arith.constant 0 : index
    %103 = vector.load %arg3[%c8_30, %c0_31] : memref<288x1xf32, #tpu.memory_space<vmem>>, vector<8x1xf32>
    %104 = vector.broadcast %103 : vector<8x1xf32> to vector<8x128xf32>
    %105 = arith.mulf %102, %104 : vector<8x128xf32>
    %106 = arith.mulf %63, %99 : vector<8x128xf32>
    %107 = arith.mulf %66, %105 : vector<8x128xf32>
    %108 = arith.addf %106, %107 : vector<8x128xf32>
    %c8_32 = arith.constant 8 : index
    %c0_33 = arith.constant 0 : index
    %109 = vector.load %arg2[%c8_32, %c0_33] : memref<96x1xf32, #tpu.memory_space<vmem>>, vector<8x1xf32>
    %110 = vector.broadcast %109 : vector<8x1xf32> to vector<8x128xf32>
    %111 = arith.subf %0, %110 : vector<8x128xf32>
    %c8_34 = arith.constant 8 : index
    %c0_35 = arith.constant 0 : index
    %112 = vector.load %arg3[%c8_34, %c0_35] : memref<288x1xf32, #tpu.memory_space<vmem>>, vector<8x1xf32>
    %113 = vector.broadcast %112 : vector<8x1xf32> to vector<8x128xf32>
    %114 = arith.mulf %111, %113 : vector<8x128xf32>
    %c24_36 = arith.constant 24 : index
    %c0_37 = arith.constant 0 : index
    %115 = vector.load %arg2[%c24_36, %c0_37] : memref<96x1xf32, #tpu.memory_space<vmem>>, vector<8x1xf32>
    %116 = vector.broadcast %115 : vector<8x1xf32> to vector<8x128xf32>
    %117 = arith.subf %116, %0 : vector<8x128xf32>
    %c16_38 = arith.constant 16 : index
    %c0_39 = arith.constant 0 : index
    %118 = vector.load %arg3[%c16_38, %c0_39] : memref<288x1xf32, #tpu.memory_space<vmem>>, vector<8x1xf32>
    %119 = vector.broadcast %118 : vector<8x1xf32> to vector<8x128xf32>
    %120 = arith.mulf %117, %119 : vector<8x128xf32>
    %121 = arith.mulf %66, %114 : vector<8x128xf32>
    %122 = arith.mulf %69, %120 : vector<8x128xf32>
    %123 = arith.addf %121, %122 : vector<8x128xf32>
    %c16_40 = arith.constant 16 : index
    %c0_41 = arith.constant 0 : index
    %124 = vector.load %arg2[%c16_40, %c0_41] : memref<96x1xf32, #tpu.memory_space<vmem>>, vector<8x1xf32>
    %125 = vector.broadcast %124 : vector<8x1xf32> to vector<8x128xf32>
    %126 = arith.subf %0, %125 : vector<8x128xf32>
    %c16_42 = arith.constant 16 : index
    %c0_43 = arith.constant 0 : index
    %127 = vector.load %arg3[%c16_42, %c0_43] : memref<288x1xf32, #tpu.memory_space<vmem>>, vector<8x1xf32>
    %128 = vector.broadcast %127 : vector<8x1xf32> to vector<8x128xf32>
    %129 = arith.mulf %126, %128 : vector<8x128xf32>
    %c32_44 = arith.constant 32 : index
    %c0_45 = arith.constant 0 : index
    %130 = vector.load %arg2[%c32_44, %c0_45] : memref<96x1xf32, #tpu.memory_space<vmem>>, vector<8x1xf32>
    %131 = vector.broadcast %130 : vector<8x1xf32> to vector<8x128xf32>
    %132 = arith.subf %131, %0 : vector<8x128xf32>
    %c24_46 = arith.constant 24 : index
    %c0_47 = arith.constant 0 : index
    %133 = vector.load %arg3[%c24_46, %c0_47] : memref<288x1xf32, #tpu.memory_space<vmem>>, vector<8x1xf32>
    %134 = vector.broadcast %133 : vector<8x1xf32> to vector<8x128xf32>
    %135 = arith.mulf %132, %134 : vector<8x128xf32>
    %136 = arith.mulf %69, %129 : vector<8x128xf32>
    %137 = arith.mulf %72, %135 : vector<8x128xf32>
    %138 = arith.addf %136, %137 : vector<8x128xf32>
    %c24_48 = arith.constant 24 : index
    %c0_49 = arith.constant 0 : index
    %139 = vector.load %arg2[%c24_48, %c0_49] : memref<96x1xf32, #tpu.memory_space<vmem>>, vector<8x1xf32>
    %140 = vector.broadcast %139 : vector<8x1xf32> to vector<8x128xf32>
    %141 = arith.subf %0, %140 : vector<8x128xf32>
    %c24_50 = arith.constant 24 : index
    %c0_51 = arith.constant 0 : index
    %142 = vector.load %arg3[%c24_50, %c0_51] : memref<288x1xf32, #tpu.memory_space<vmem>>, vector<8x1xf32>
    %143 = vector.broadcast %142 : vector<8x1xf32> to vector<8x128xf32>
    %144 = arith.mulf %141, %143 : vector<8x128xf32>
    %c40_52 = arith.constant 40 : index
    %c0_53 = arith.constant 0 : index
    %145 = vector.load %arg2[%c40_52, %c0_53] : memref<96x1xf32, #tpu.memory_space<vmem>>, vector<8x1xf32>
    %146 = vector.broadcast %145 : vector<8x1xf32> to vector<8x128xf32>
    %147 = arith.subf %146, %0 : vector<8x128xf32>
    %c32_54 = arith.constant 32 : index
    %c0_55 = arith.constant 0 : index
    %148 = vector.load %arg3[%c32_54, %c0_55] : memref<288x1xf32, #tpu.memory_space<vmem>>, vector<8x1xf32>
    %149 = vector.broadcast %148 : vector<8x1xf32> to vector<8x128xf32>
    %150 = arith.mulf %147, %149 : vector<8x128xf32>
    %151 = arith.mulf %72, %144 : vector<8x128xf32>
    %152 = arith.mulf %75, %150 : vector<8x128xf32>
    %153 = arith.addf %151, %152 : vector<8x128xf32>
    %c32_56 = arith.constant 32 : index
    %c0_57 = arith.constant 0 : index
    %154 = vector.load %arg2[%c32_56, %c0_57] : memref<96x1xf32, #tpu.memory_space<vmem>>, vector<8x1xf32>
    %155 = vector.broadcast %154 : vector<8x1xf32> to vector<8x128xf32>
    %156 = arith.subf %0, %155 : vector<8x128xf32>
    %c32_58 = arith.constant 32 : index
    %c0_59 = arith.constant 0 : index
    %157 = vector.load %arg3[%c32_58, %c0_59] : memref<288x1xf32, #tpu.memory_space<vmem>>, vector<8x1xf32>
    %158 = vector.broadcast %157 : vector<8x1xf32> to vector<8x128xf32>
    %159 = arith.mulf %156, %158 : vector<8x128xf32>
    %c48_60 = arith.constant 48 : index
    %c0_61 = arith.constant 0 : index
    %160 = vector.load %arg2[%c48_60, %c0_61] : memref<96x1xf32, #tpu.memory_space<vmem>>, vector<8x1xf32>
    %161 = vector.broadcast %160 : vector<8x1xf32> to vector<8x128xf32>
    %162 = arith.subf %161, %0 : vector<8x128xf32>
    %c40_62 = arith.constant 40 : index
    %c0_63 = arith.constant 0 : index
    %163 = vector.load %arg3[%c40_62, %c0_63] : memref<288x1xf32, #tpu.memory_space<vmem>>, vector<8x1xf32>
    %164 = vector.broadcast %163 : vector<8x1xf32> to vector<8x128xf32>
    %165 = arith.mulf %162, %164 : vector<8x128xf32>
    %166 = arith.mulf %75, %159 : vector<8x128xf32>
    %167 = arith.mulf %78, %165 : vector<8x128xf32>
    %168 = arith.addf %166, %167 : vector<8x128xf32>
    %c40_64 = arith.constant 40 : index
    %c0_65 = arith.constant 0 : index
    %169 = vector.load %arg2[%c40_64, %c0_65] : memref<96x1xf32, #tpu.memory_space<vmem>>, vector<8x1xf32>
    %170 = vector.broadcast %169 : vector<8x1xf32> to vector<8x128xf32>
    %171 = arith.subf %0, %170 : vector<8x128xf32>
    %c40_66 = arith.constant 40 : index
    %c0_67 = arith.constant 0 : index
    %172 = vector.load %arg3[%c40_66, %c0_67] : memref<288x1xf32, #tpu.memory_space<vmem>>, vector<8x1xf32>
    %173 = vector.broadcast %172 : vector<8x1xf32> to vector<8x128xf32>
    %174 = arith.mulf %171, %173 : vector<8x128xf32>
    %c56_68 = arith.constant 56 : index
    %c0_69 = arith.constant 0 : index
    %175 = vector.load %arg2[%c56_68, %c0_69] : memref<96x1xf32, #tpu.memory_space<vmem>>, vector<8x1xf32>
    %176 = vector.broadcast %175 : vector<8x1xf32> to vector<8x128xf32>
    %177 = arith.subf %176, %0 : vector<8x128xf32>
    %c48_70 = arith.constant 48 : index
    %c0_71 = arith.constant 0 : index
    %178 = vector.load %arg3[%c48_70, %c0_71] : memref<288x1xf32, #tpu.memory_space<vmem>>, vector<8x1xf32>
    %179 = vector.broadcast %178 : vector<8x1xf32> to vector<8x128xf32>
    %180 = arith.mulf %177, %179 : vector<8x128xf32>
    %181 = arith.mulf %78, %174 : vector<8x128xf32>
    %182 = arith.mulf %81, %180 : vector<8x128xf32>
    %183 = arith.addf %181, %182 : vector<8x128xf32>
    %c48_72 = arith.constant 48 : index
    %c0_73 = arith.constant 0 : index
    %184 = vector.load %arg2[%c48_72, %c0_73] : memref<96x1xf32, #tpu.memory_space<vmem>>, vector<8x1xf32>
    %185 = vector.broadcast %184 : vector<8x1xf32> to vector<8x128xf32>
    %186 = arith.subf %0, %185 : vector<8x128xf32>
    %c48_74 = arith.constant 48 : index
    %c0_75 = arith.constant 0 : index
    %187 = vector.load %arg3[%c48_74, %c0_75] : memref<288x1xf32, #tpu.memory_space<vmem>>, vector<8x1xf32>
    %188 = vector.broadcast %187 : vector<8x1xf32> to vector<8x128xf32>
    %189 = arith.mulf %186, %188 : vector<8x128xf32>
    %c64_76 = arith.constant 64 : index
    %c0_77 = arith.constant 0 : index
    %190 = vector.load %arg2[%c64_76, %c0_77] : memref<96x1xf32, #tpu.memory_space<vmem>>, vector<8x1xf32>
    %191 = vector.broadcast %190 : vector<8x1xf32> to vector<8x128xf32>
    %192 = arith.subf %191, %0 : vector<8x128xf32>
    %c56_78 = arith.constant 56 : index
    %c0_79 = arith.constant 0 : index
    %193 = vector.load %arg3[%c56_78, %c0_79] : memref<288x1xf32, #tpu.memory_space<vmem>>, vector<8x1xf32>
    %194 = vector.broadcast %193 : vector<8x1xf32> to vector<8x128xf32>
    %195 = arith.mulf %192, %194 : vector<8x128xf32>
    %196 = arith.mulf %81, %189 : vector<8x128xf32>
    %197 = arith.mulf %84, %195 : vector<8x128xf32>
    %198 = arith.addf %196, %197 : vector<8x128xf32>
    %c56_80 = arith.constant 56 : index
    %c0_81 = arith.constant 0 : index
    %199 = vector.load %arg2[%c56_80, %c0_81] : memref<96x1xf32, #tpu.memory_space<vmem>>, vector<8x1xf32>
    %200 = vector.broadcast %199 : vector<8x1xf32> to vector<8x128xf32>
    %201 = arith.subf %0, %200 : vector<8x128xf32>
    %c56_82 = arith.constant 56 : index
    %c0_83 = arith.constant 0 : index
    %202 = vector.load %arg3[%c56_82, %c0_83] : memref<288x1xf32, #tpu.memory_space<vmem>>, vector<8x1xf32>
    %203 = vector.broadcast %202 : vector<8x1xf32> to vector<8x128xf32>
    %204 = arith.mulf %201, %203 : vector<8x128xf32>
    %c72_84 = arith.constant 72 : index
    %c0_85 = arith.constant 0 : index
    %205 = vector.load %arg2[%c72_84, %c0_85] : memref<96x1xf32, #tpu.memory_space<vmem>>, vector<8x1xf32>
    %206 = vector.broadcast %205 : vector<8x1xf32> to vector<8x128xf32>
    %207 = arith.subf %206, %0 : vector<8x128xf32>
    %c64_86 = arith.constant 64 : index
    %c0_87 = arith.constant 0 : index
    %208 = vector.load %arg3[%c64_86, %c0_87] : memref<288x1xf32, #tpu.memory_space<vmem>>, vector<8x1xf32>
    %209 = vector.broadcast %208 : vector<8x1xf32> to vector<8x128xf32>
    %210 = arith.mulf %207, %209 : vector<8x128xf32>
    %211 = arith.mulf %84, %204 : vector<8x128xf32>
    %212 = arith.mulf %87, %210 : vector<8x128xf32>
    %213 = arith.addf %211, %212 : vector<8x128xf32>
    %c64_88 = arith.constant 64 : index
    %c0_89 = arith.constant 0 : index
    %214 = vector.load %arg2[%c64_88, %c0_89] : memref<96x1xf32, #tpu.memory_space<vmem>>, vector<8x1xf32>
    %215 = vector.broadcast %214 : vector<8x1xf32> to vector<8x128xf32>
    %216 = arith.subf %0, %215 : vector<8x128xf32>
    %c64_90 = arith.constant 64 : index
    %c0_91 = arith.constant 0 : index
    %217 = vector.load %arg3[%c64_90, %c0_91] : memref<288x1xf32, #tpu.memory_space<vmem>>, vector<8x1xf32>
    %218 = vector.broadcast %217 : vector<8x1xf32> to vector<8x128xf32>
    %219 = arith.mulf %216, %218 : vector<8x128xf32>
    %c80_92 = arith.constant 80 : index
    %c0_93 = arith.constant 0 : index
    %220 = vector.load %arg2[%c80_92, %c0_93] : memref<96x1xf32, #tpu.memory_space<vmem>>, vector<8x1xf32>
    %221 = vector.broadcast %220 : vector<8x1xf32> to vector<8x128xf32>
    %222 = arith.subf %221, %0 : vector<8x128xf32>
    %c72_94 = arith.constant 72 : index
    %c0_95 = arith.constant 0 : index
    %223 = vector.load %arg3[%c72_94, %c0_95] : memref<288x1xf32, #tpu.memory_space<vmem>>, vector<8x1xf32>
    %224 = vector.broadcast %223 : vector<8x1xf32> to vector<8x128xf32>
    %225 = arith.mulf %222, %224 : vector<8x128xf32>
    %226 = arith.mulf %87, %219 : vector<8x128xf32>
    %227 = arith.mulf %90, %225 : vector<8x128xf32>
    %228 = arith.addf %226, %227 : vector<8x128xf32>
    %c72_96 = arith.constant 72 : index
    %c0_97 = arith.constant 0 : index
    %229 = vector.load %arg2[%c72_96, %c0_97] : memref<96x1xf32, #tpu.memory_space<vmem>>, vector<8x1xf32>
    %230 = vector.broadcast %229 : vector<8x1xf32> to vector<8x128xf32>
    %231 = arith.subf %0, %230 : vector<8x128xf32>
    %c72_98 = arith.constant 72 : index
    %c0_99 = arith.constant 0 : index
    %232 = vector.load %arg3[%c72_98, %c0_99] : memref<288x1xf32, #tpu.memory_space<vmem>>, vector<8x1xf32>
    %233 = vector.broadcast %232 : vector<8x1xf32> to vector<8x128xf32>
    %234 = arith.mulf %231, %233 : vector<8x128xf32>
    %c88_100 = arith.constant 88 : index
    %c0_101 = arith.constant 0 : index
    %235 = vector.load %arg2[%c88_100, %c0_101] : memref<96x1xf32, #tpu.memory_space<vmem>>, vector<8x1xf32>
    %236 = vector.broadcast %235 : vector<8x1xf32> to vector<8x128xf32>
    %237 = arith.subf %236, %0 : vector<8x128xf32>
    %c80_102 = arith.constant 80 : index
    %c0_103 = arith.constant 0 : index
    %238 = vector.load %arg3[%c80_102, %c0_103] : memref<288x1xf32, #tpu.memory_space<vmem>>, vector<8x1xf32>
    %239 = vector.broadcast %238 : vector<8x1xf32> to vector<8x128xf32>
    %240 = arith.mulf %237, %239 : vector<8x128xf32>
    %241 = arith.mulf %90, %234 : vector<8x128xf32>
    %242 = arith.mulf %93, %240 : vector<8x128xf32>
    %243 = arith.addf %241, %242 : vector<8x128xf32>
    %c0_104 = arith.constant 0 : index
    %c0_105 = arith.constant 0 : index
    %244 = vector.load %arg2[%c0_104, %c0_105] : memref<96x1xf32, #tpu.memory_space<vmem>>, vector<8x1xf32>
    %245 = vector.broadcast %244 : vector<8x1xf32> to vector<8x128xf32>
    %246 = arith.subf %0, %245 : vector<8x128xf32>
    %c96 = arith.constant 96 : index
    %c0_106 = arith.constant 0 : index
    %247 = vector.load %arg3[%c96, %c0_106] : memref<288x1xf32, #tpu.memory_space<vmem>>, vector<8x1xf32>
    %248 = vector.broadcast %247 : vector<8x1xf32> to vector<8x128xf32>
    %249 = arith.mulf %246, %248 : vector<8x128xf32>
    %c24_107 = arith.constant 24 : index
    %c0_108 = arith.constant 0 : index
    %250 = vector.load %arg2[%c24_107, %c0_108] : memref<96x1xf32, #tpu.memory_space<vmem>>, vector<8x1xf32>
    %251 = vector.broadcast %250 : vector<8x1xf32> to vector<8x128xf32>
    %252 = arith.subf %251, %0 : vector<8x128xf32>
    %c104 = arith.constant 104 : index
    %c0_109 = arith.constant 0 : index
    %253 = vector.load %arg3[%c104, %c0_109] : memref<288x1xf32, #tpu.memory_space<vmem>>, vector<8x1xf32>
    %254 = vector.broadcast %253 : vector<8x1xf32> to vector<8x128xf32>
    %255 = arith.mulf %252, %254 : vector<8x128xf32>
    %256 = arith.mulf %108, %249 : vector<8x128xf32>
    %257 = arith.mulf %123, %255 : vector<8x128xf32>
    %258 = arith.addf %256, %257 : vector<8x128xf32>
    %c8_110 = arith.constant 8 : index
    %c0_111 = arith.constant 0 : index
    %259 = vector.load %arg2[%c8_110, %c0_111] : memref<96x1xf32, #tpu.memory_space<vmem>>, vector<8x1xf32>
    %260 = vector.broadcast %259 : vector<8x1xf32> to vector<8x128xf32>
    %261 = arith.subf %0, %260 : vector<8x128xf32>
    %c104_112 = arith.constant 104 : index
    %c0_113 = arith.constant 0 : index
    %262 = vector.load %arg3[%c104_112, %c0_113] : memref<288x1xf32, #tpu.memory_space<vmem>>, vector<8x1xf32>
    %263 = vector.broadcast %262 : vector<8x1xf32> to vector<8x128xf32>
    %264 = arith.mulf %261, %263 : vector<8x128xf32>
    %c32_114 = arith.constant 32 : index
    %c0_115 = arith.constant 0 : index
    %265 = vector.load %arg2[%c32_114, %c0_115] : memref<96x1xf32, #tpu.memory_space<vmem>>, vector<8x1xf32>
    %266 = vector.broadcast %265 : vector<8x1xf32> to vector<8x128xf32>
    %267 = arith.subf %266, %0 : vector<8x128xf32>
    %c112 = arith.constant 112 : index
    %c0_116 = arith.constant 0 : index
    %268 = vector.load %arg3[%c112, %c0_116] : memref<288x1xf32, #tpu.memory_space<vmem>>, vector<8x1xf32>
    %269 = vector.broadcast %268 : vector<8x1xf32> to vector<8x128xf32>
    %270 = arith.mulf %267, %269 : vector<8x128xf32>
    %271 = arith.mulf %123, %264 : vector<8x128xf32>
    %272 = arith.mulf %138, %270 : vector<8x128xf32>
    %273 = arith.addf %271, %272 : vector<8x128xf32>
    %c16_117 = arith.constant 16 : index
    %c0_118 = arith.constant 0 : index
    %274 = vector.load %arg2[%c16_117, %c0_118] : memref<96x1xf32, #tpu.memory_space<vmem>>, vector<8x1xf32>
    %275 = vector.broadcast %274 : vector<8x1xf32> to vector<8x128xf32>
    %276 = arith.subf %0, %275 : vector<8x128xf32>
    %c112_119 = arith.constant 112 : index
    %c0_120 = arith.constant 0 : index
    %277 = vector.load %arg3[%c112_119, %c0_120] : memref<288x1xf32, #tpu.memory_space<vmem>>, vector<8x1xf32>
    %278 = vector.broadcast %277 : vector<8x1xf32> to vector<8x128xf32>
    %279 = arith.mulf %276, %278 : vector<8x128xf32>
    %c40_121 = arith.constant 40 : index
    %c0_122 = arith.constant 0 : index
    %280 = vector.load %arg2[%c40_121, %c0_122] : memref<96x1xf32, #tpu.memory_space<vmem>>, vector<8x1xf32>
    %281 = vector.broadcast %280 : vector<8x1xf32> to vector<8x128xf32>
    %282 = arith.subf %281, %0 : vector<8x128xf32>
    %c120 = arith.constant 120 : index
    %c0_123 = arith.constant 0 : index
    %283 = vector.load %arg3[%c120, %c0_123] : memref<288x1xf32, #tpu.memory_space<vmem>>, vector<8x1xf32>
    %284 = vector.broadcast %283 : vector<8x1xf32> to vector<8x128xf32>
    %285 = arith.mulf %282, %284 : vector<8x128xf32>
    %286 = arith.mulf %138, %279 : vector<8x128xf32>
    %287 = arith.mulf %153, %285 : vector<8x128xf32>
    %288 = arith.addf %286, %287 : vector<8x128xf32>
    %c24_124 = arith.constant 24 : index
    %c0_125 = arith.constant 0 : index
    %289 = vector.load %arg2[%c24_124, %c0_125] : memref<96x1xf32, #tpu.memory_space<vmem>>, vector<8x1xf32>
    %290 = vector.broadcast %289 : vector<8x1xf32> to vector<8x128xf32>
    %291 = arith.subf %0, %290 : vector<8x128xf32>
    %c120_126 = arith.constant 120 : index
    %c0_127 = arith.constant 0 : index
    %292 = vector.load %arg3[%c120_126, %c0_127] : memref<288x1xf32, #tpu.memory_space<vmem>>, vector<8x1xf32>
    %293 = vector.broadcast %292 : vector<8x1xf32> to vector<8x128xf32>
    %294 = arith.mulf %291, %293 : vector<8x128xf32>
    %c48_128 = arith.constant 48 : index
    %c0_129 = arith.constant 0 : index
    %295 = vector.load %arg2[%c48_128, %c0_129] : memref<96x1xf32, #tpu.memory_space<vmem>>, vector<8x1xf32>
    %296 = vector.broadcast %295 : vector<8x1xf32> to vector<8x128xf32>
    %297 = arith.subf %296, %0 : vector<8x128xf32>
    %c128 = arith.constant 128 : index
    %c0_130 = arith.constant 0 : index
    %298 = vector.load %arg3[%c128, %c0_130] : memref<288x1xf32, #tpu.memory_space<vmem>>, vector<8x1xf32>
    %299 = vector.broadcast %298 : vector<8x1xf32> to vector<8x128xf32>
    %300 = arith.mulf %297, %299 : vector<8x128xf32>
    %301 = arith.mulf %153, %294 : vector<8x128xf32>
    %302 = arith.mulf %168, %300 : vector<8x128xf32>
    %303 = arith.addf %301, %302 : vector<8x128xf32>
    %c32_131 = arith.constant 32 : index
    %c0_132 = arith.constant 0 : index
    %304 = vector.load %arg2[%c32_131, %c0_132] : memref<96x1xf32, #tpu.memory_space<vmem>>, vector<8x1xf32>
    %305 = vector.broadcast %304 : vector<8x1xf32> to vector<8x128xf32>
    %306 = arith.subf %0, %305 : vector<8x128xf32>
    %c128_133 = arith.constant 128 : index
    %c0_134 = arith.constant 0 : index
    %307 = vector.load %arg3[%c128_133, %c0_134] : memref<288x1xf32, #tpu.memory_space<vmem>>, vector<8x1xf32>
    %308 = vector.broadcast %307 : vector<8x1xf32> to vector<8x128xf32>
    %309 = arith.mulf %306, %308 : vector<8x128xf32>
    %c56_135 = arith.constant 56 : index
    %c0_136 = arith.constant 0 : index
    %310 = vector.load %arg2[%c56_135, %c0_136] : memref<96x1xf32, #tpu.memory_space<vmem>>, vector<8x1xf32>
    %311 = vector.broadcast %310 : vector<8x1xf32> to vector<8x128xf32>
    %312 = arith.subf %311, %0 : vector<8x128xf32>
    %c136 = arith.constant 136 : index
    %c0_137 = arith.constant 0 : index
    %313 = vector.load %arg3[%c136, %c0_137] : memref<288x1xf32, #tpu.memory_space<vmem>>, vector<8x1xf32>
    %314 = vector.broadcast %313 : vector<8x1xf32> to vector<8x128xf32>
    %315 = arith.mulf %312, %314 : vector<8x128xf32>
    %316 = arith.mulf %168, %309 : vector<8x128xf32>
    %317 = arith.mulf %183, %315 : vector<8x128xf32>
    %318 = arith.addf %316, %317 : vector<8x128xf32>
    %c40_138 = arith.constant 40 : index
    %c0_139 = arith.constant 0 : index
    %319 = vector.load %arg2[%c40_138, %c0_139] : memref<96x1xf32, #tpu.memory_space<vmem>>, vector<8x1xf32>
    %320 = vector.broadcast %319 : vector<8x1xf32> to vector<8x128xf32>
    %321 = arith.subf %0, %320 : vector<8x128xf32>
    %c136_140 = arith.constant 136 : index
    %c0_141 = arith.constant 0 : index
    %322 = vector.load %arg3[%c136_140, %c0_141] : memref<288x1xf32, #tpu.memory_space<vmem>>, vector<8x1xf32>
    %323 = vector.broadcast %322 : vector<8x1xf32> to vector<8x128xf32>
    %324 = arith.mulf %321, %323 : vector<8x128xf32>
    %c64_142 = arith.constant 64 : index
    %c0_143 = arith.constant 0 : index
    %325 = vector.load %arg2[%c64_142, %c0_143] : memref<96x1xf32, #tpu.memory_space<vmem>>, vector<8x1xf32>
    %326 = vector.broadcast %325 : vector<8x1xf32> to vector<8x128xf32>
    %327 = arith.subf %326, %0 : vector<8x128xf32>
    %c144 = arith.constant 144 : index
    %c0_144 = arith.constant 0 : index
    %328 = vector.load %arg3[%c144, %c0_144] : memref<288x1xf32, #tpu.memory_space<vmem>>, vector<8x1xf32>
    %329 = vector.broadcast %328 : vector<8x1xf32> to vector<8x128xf32>
    %330 = arith.mulf %327, %329 : vector<8x128xf32>
    %331 = arith.mulf %183, %324 : vector<8x128xf32>
    %332 = arith.mulf %198, %330 : vector<8x128xf32>
    %333 = arith.addf %331, %332 : vector<8x128xf32>
    %c48_145 = arith.constant 48 : index
    %c0_146 = arith.constant 0 : index
    %334 = vector.load %arg2[%c48_145, %c0_146] : memref<96x1xf32, #tpu.memory_space<vmem>>, vector<8x1xf32>
    %335 = vector.broadcast %334 : vector<8x1xf32> to vector<8x128xf32>
    %336 = arith.subf %0, %335 : vector<8x128xf32>
    %c144_147 = arith.constant 144 : index
    %c0_148 = arith.constant 0 : index
    %337 = vector.load %arg3[%c144_147, %c0_148] : memref<288x1xf32, #tpu.memory_space<vmem>>, vector<8x1xf32>
    %338 = vector.broadcast %337 : vector<8x1xf32> to vector<8x128xf32>
    %339 = arith.mulf %336, %338 : vector<8x128xf32>
    %c72_149 = arith.constant 72 : index
    %c0_150 = arith.constant 0 : index
    %340 = vector.load %arg2[%c72_149, %c0_150] : memref<96x1xf32, #tpu.memory_space<vmem>>, vector<8x1xf32>
    %341 = vector.broadcast %340 : vector<8x1xf32> to vector<8x128xf32>
    %342 = arith.subf %341, %0 : vector<8x128xf32>
    %c152 = arith.constant 152 : index
    %c0_151 = arith.constant 0 : index
    %343 = vector.load %arg3[%c152, %c0_151] : memref<288x1xf32, #tpu.memory_space<vmem>>, vector<8x1xf32>
    %344 = vector.broadcast %343 : vector<8x1xf32> to vector<8x128xf32>
    %345 = arith.mulf %342, %344 : vector<8x128xf32>
    %346 = arith.mulf %198, %339 : vector<8x128xf32>
    %347 = arith.mulf %213, %345 : vector<8x128xf32>
    %348 = arith.addf %346, %347 : vector<8x128xf32>
    %c56_152 = arith.constant 56 : index
    %c0_153 = arith.constant 0 : index
    %349 = vector.load %arg2[%c56_152, %c0_153] : memref<96x1xf32, #tpu.memory_space<vmem>>, vector<8x1xf32>
    %350 = vector.broadcast %349 : vector<8x1xf32> to vector<8x128xf32>
    %351 = arith.subf %0, %350 : vector<8x128xf32>
    %c152_154 = arith.constant 152 : index
    %c0_155 = arith.constant 0 : index
    %352 = vector.load %arg3[%c152_154, %c0_155] : memref<288x1xf32, #tpu.memory_space<vmem>>, vector<8x1xf32>
    %353 = vector.broadcast %352 : vector<8x1xf32> to vector<8x128xf32>
    %354 = arith.mulf %351, %353 : vector<8x128xf32>
    %c80_156 = arith.constant 80 : index
    %c0_157 = arith.constant 0 : index
    %355 = vector.load %arg2[%c80_156, %c0_157] : memref<96x1xf32, #tpu.memory_space<vmem>>, vector<8x1xf32>
    %356 = vector.broadcast %355 : vector<8x1xf32> to vector<8x128xf32>
    %357 = arith.subf %356, %0 : vector<8x128xf32>
    %c160 = arith.constant 160 : index
    %c0_158 = arith.constant 0 : index
    %358 = vector.load %arg3[%c160, %c0_158] : memref<288x1xf32, #tpu.memory_space<vmem>>, vector<8x1xf32>
    %359 = vector.broadcast %358 : vector<8x1xf32> to vector<8x128xf32>
    %360 = arith.mulf %357, %359 : vector<8x128xf32>
    %361 = arith.mulf %213, %354 : vector<8x128xf32>
    %362 = arith.mulf %228, %360 : vector<8x128xf32>
    %363 = arith.addf %361, %362 : vector<8x128xf32>
    %c64_159 = arith.constant 64 : index
    %c0_160 = arith.constant 0 : index
    %364 = vector.load %arg2[%c64_159, %c0_160] : memref<96x1xf32, #tpu.memory_space<vmem>>, vector<8x1xf32>
    %365 = vector.broadcast %364 : vector<8x1xf32> to vector<8x128xf32>
    %366 = arith.subf %0, %365 : vector<8x128xf32>
    %c160_161 = arith.constant 160 : index
    %c0_162 = arith.constant 0 : index
    %367 = vector.load %arg3[%c160_161, %c0_162] : memref<288x1xf32, #tpu.memory_space<vmem>>, vector<8x1xf32>
    %368 = vector.broadcast %367 : vector<8x1xf32> to vector<8x128xf32>
    %369 = arith.mulf %366, %368 : vector<8x128xf32>
    %c88_163 = arith.constant 88 : index
    %c0_164 = arith.constant 0 : index
    %370 = vector.load %arg2[%c88_163, %c0_164] : memref<96x1xf32, #tpu.memory_space<vmem>>, vector<8x1xf32>
    %371 = vector.broadcast %370 : vector<8x1xf32> to vector<8x128xf32>
    %372 = arith.subf %371, %0 : vector<8x128xf32>
    %c168 = arith.constant 168 : index
    %c0_165 = arith.constant 0 : index
    %373 = vector.load %arg3[%c168, %c0_165] : memref<288x1xf32, #tpu.memory_space<vmem>>, vector<8x1xf32>
    %374 = vector.broadcast %373 : vector<8x1xf32> to vector<8x128xf32>
    %375 = arith.mulf %372, %374 : vector<8x128xf32>
    %376 = arith.mulf %228, %369 : vector<8x128xf32>
    %377 = arith.mulf %243, %375 : vector<8x128xf32>
    %378 = arith.addf %376, %377 : vector<8x128xf32>
    %c0_166 = arith.constant 0 : index
    %c0_167 = arith.constant 0 : index
    %379 = vector.load %arg2[%c0_166, %c0_167] : memref<96x1xf32, #tpu.memory_space<vmem>>, vector<8x1xf32>
    %380 = vector.broadcast %379 : vector<8x1xf32> to vector<8x128xf32>
    %381 = arith.subf %0, %380 : vector<8x128xf32>
    %c192 = arith.constant 192 : index
    %c0_168 = arith.constant 0 : index
    %382 = vector.load %arg3[%c192, %c0_168] : memref<288x1xf32, #tpu.memory_space<vmem>>, vector<8x1xf32>
    %383 = vector.broadcast %382 : vector<8x1xf32> to vector<8x128xf32>
    %384 = arith.mulf %381, %383 : vector<8x128xf32>
    %c32_169 = arith.constant 32 : index
    %c0_170 = arith.constant 0 : index
    %385 = vector.load %arg2[%c32_169, %c0_170] : memref<96x1xf32, #tpu.memory_space<vmem>>, vector<8x1xf32>
    %386 = vector.broadcast %385 : vector<8x1xf32> to vector<8x128xf32>
    %387 = arith.subf %386, %0 : vector<8x128xf32>
    %c200 = arith.constant 200 : index
    %c0_171 = arith.constant 0 : index
    %388 = vector.load %arg3[%c200, %c0_171] : memref<288x1xf32, #tpu.memory_space<vmem>>, vector<8x1xf32>
    %389 = vector.broadcast %388 : vector<8x1xf32> to vector<8x128xf32>
    %390 = arith.mulf %387, %389 : vector<8x128xf32>
    %391 = arith.mulf %258, %384 : vector<8x128xf32>
    %392 = arith.mulf %273, %390 : vector<8x128xf32>
    %393 = arith.addf %391, %392 : vector<8x128xf32>
    %c8_172 = arith.constant 8 : index
    %c0_173 = arith.constant 0 : index
    %394 = vector.load %arg2[%c8_172, %c0_173] : memref<96x1xf32, #tpu.memory_space<vmem>>, vector<8x1xf32>
    %395 = vector.broadcast %394 : vector<8x1xf32> to vector<8x128xf32>
    %396 = arith.subf %0, %395 : vector<8x128xf32>
    %c200_174 = arith.constant 200 : index
    %c0_175 = arith.constant 0 : index
    %397 = vector.load %arg3[%c200_174, %c0_175] : memref<288x1xf32, #tpu.memory_space<vmem>>, vector<8x1xf32>
    %398 = vector.broadcast %397 : vector<8x1xf32> to vector<8x128xf32>
    %399 = arith.mulf %396, %398 : vector<8x128xf32>
    %c40_176 = arith.constant 40 : index
    %c0_177 = arith.constant 0 : index
    %400 = vector.load %arg2[%c40_176, %c0_177] : memref<96x1xf32, #tpu.memory_space<vmem>>, vector<8x1xf32>
    %401 = vector.broadcast %400 : vector<8x1xf32> to vector<8x128xf32>
    %402 = arith.subf %401, %0 : vector<8x128xf32>
    %c208 = arith.constant 208 : index
    %c0_178 = arith.constant 0 : index
    %403 = vector.load %arg3[%c208, %c0_178] : memref<288x1xf32, #tpu.memory_space<vmem>>, vector<8x1xf32>
    %404 = vector.broadcast %403 : vector<8x1xf32> to vector<8x128xf32>
    %405 = arith.mulf %402, %404 : vector<8x128xf32>
    %406 = arith.mulf %273, %399 : vector<8x128xf32>
    %407 = arith.mulf %288, %405 : vector<8x128xf32>
    %408 = arith.addf %406, %407 : vector<8x128xf32>
    %c16_179 = arith.constant 16 : index
    %c0_180 = arith.constant 0 : index
    %409 = vector.load %arg2[%c16_179, %c0_180] : memref<96x1xf32, #tpu.memory_space<vmem>>, vector<8x1xf32>
    %410 = vector.broadcast %409 : vector<8x1xf32> to vector<8x128xf32>
    %411 = arith.subf %0, %410 : vector<8x128xf32>
    %c208_181 = arith.constant 208 : index
    %c0_182 = arith.constant 0 : index
    %412 = vector.load %arg3[%c208_181, %c0_182] : memref<288x1xf32, #tpu.memory_space<vmem>>, vector<8x1xf32>
    %413 = vector.broadcast %412 : vector<8x1xf32> to vector<8x128xf32>
    %414 = arith.mulf %411, %413 : vector<8x128xf32>
    %c48_183 = arith.constant 48 : index
    %c0_184 = arith.constant 0 : index
    %415 = vector.load %arg2[%c48_183, %c0_184] : memref<96x1xf32, #tpu.memory_space<vmem>>, vector<8x1xf32>
    %416 = vector.broadcast %415 : vector<8x1xf32> to vector<8x128xf32>
    %417 = arith.subf %416, %0 : vector<8x128xf32>
    %c216 = arith.constant 216 : index
    %c0_185 = arith.constant 0 : index
    %418 = vector.load %arg3[%c216, %c0_185] : memref<288x1xf32, #tpu.memory_space<vmem>>, vector<8x1xf32>
    %419 = vector.broadcast %418 : vector<8x1xf32> to vector<8x128xf32>
    %420 = arith.mulf %417, %419 : vector<8x128xf32>
    %421 = arith.mulf %288, %414 : vector<8x128xf32>
    %422 = arith.mulf %303, %420 : vector<8x128xf32>
    %423 = arith.addf %421, %422 : vector<8x128xf32>
    %c24_186 = arith.constant 24 : index
    %c0_187 = arith.constant 0 : index
    %424 = vector.load %arg2[%c24_186, %c0_187] : memref<96x1xf32, #tpu.memory_space<vmem>>, vector<8x1xf32>
    %425 = vector.broadcast %424 : vector<8x1xf32> to vector<8x128xf32>
    %426 = arith.subf %0, %425 : vector<8x128xf32>
    %c216_188 = arith.constant 216 : index
    %c0_189 = arith.constant 0 : index
    %427 = vector.load %arg3[%c216_188, %c0_189] : memref<288x1xf32, #tpu.memory_space<vmem>>, vector<8x1xf32>
    %428 = vector.broadcast %427 : vector<8x1xf32> to vector<8x128xf32>
    %429 = arith.mulf %426, %428 : vector<8x128xf32>
    %c56_190 = arith.constant 56 : index
    %c0_191 = arith.constant 0 : index
    %430 = vector.load %arg2[%c56_190, %c0_191] : memref<96x1xf32, #tpu.memory_space<vmem>>, vector<8x1xf32>
    %431 = vector.broadcast %430 : vector<8x1xf32> to vector<8x128xf32>
    %432 = arith.subf %431, %0 : vector<8x128xf32>
    %c224 = arith.constant 224 : index
    %c0_192 = arith.constant 0 : index
    %433 = vector.load %arg3[%c224, %c0_192] : memref<288x1xf32, #tpu.memory_space<vmem>>, vector<8x1xf32>
    %434 = vector.broadcast %433 : vector<8x1xf32> to vector<8x128xf32>
    %435 = arith.mulf %432, %434 : vector<8x128xf32>
    %436 = arith.mulf %303, %429 : vector<8x128xf32>
    %437 = arith.mulf %318, %435 : vector<8x128xf32>
    %438 = arith.addf %436, %437 : vector<8x128xf32>
    %c32_193 = arith.constant 32 : index
    %c0_194 = arith.constant 0 : index
    %439 = vector.load %arg2[%c32_193, %c0_194] : memref<96x1xf32, #tpu.memory_space<vmem>>, vector<8x1xf32>
    %440 = vector.broadcast %439 : vector<8x1xf32> to vector<8x128xf32>
    %441 = arith.subf %0, %440 : vector<8x128xf32>
    %c224_195 = arith.constant 224 : index
    %c0_196 = arith.constant 0 : index
    %442 = vector.load %arg3[%c224_195, %c0_196] : memref<288x1xf32, #tpu.memory_space<vmem>>, vector<8x1xf32>
    %443 = vector.broadcast %442 : vector<8x1xf32> to vector<8x128xf32>
    %444 = arith.mulf %441, %443 : vector<8x128xf32>
    %c64_197 = arith.constant 64 : index
    %c0_198 = arith.constant 0 : index
    %445 = vector.load %arg2[%c64_197, %c0_198] : memref<96x1xf32, #tpu.memory_space<vmem>>, vector<8x1xf32>
    %446 = vector.broadcast %445 : vector<8x1xf32> to vector<8x128xf32>
    %447 = arith.subf %446, %0 : vector<8x128xf32>
    %c232 = arith.constant 232 : index
    %c0_199 = arith.constant 0 : index
    %448 = vector.load %arg3[%c232, %c0_199] : memref<288x1xf32, #tpu.memory_space<vmem>>, vector<8x1xf32>
    %449 = vector.broadcast %448 : vector<8x1xf32> to vector<8x128xf32>
    %450 = arith.mulf %447, %449 : vector<8x128xf32>
    %451 = arith.mulf %318, %444 : vector<8x128xf32>
    %452 = arith.mulf %333, %450 : vector<8x128xf32>
    %453 = arith.addf %451, %452 : vector<8x128xf32>
    %c40_200 = arith.constant 40 : index
    %c0_201 = arith.constant 0 : index
    %454 = vector.load %arg2[%c40_200, %c0_201] : memref<96x1xf32, #tpu.memory_space<vmem>>, vector<8x1xf32>
    %455 = vector.broadcast %454 : vector<8x1xf32> to vector<8x128xf32>
    %456 = arith.subf %0, %455 : vector<8x128xf32>
    %c232_202 = arith.constant 232 : index
    %c0_203 = arith.constant 0 : index
    %457 = vector.load %arg3[%c232_202, %c0_203] : memref<288x1xf32, #tpu.memory_space<vmem>>, vector<8x1xf32>
    %458 = vector.broadcast %457 : vector<8x1xf32> to vector<8x128xf32>
    %459 = arith.mulf %456, %458 : vector<8x128xf32>
    %c72_204 = arith.constant 72 : index
    %c0_205 = arith.constant 0 : index
    %460 = vector.load %arg2[%c72_204, %c0_205] : memref<96x1xf32, #tpu.memory_space<vmem>>, vector<8x1xf32>
    %461 = vector.broadcast %460 : vector<8x1xf32> to vector<8x128xf32>
    %462 = arith.subf %461, %0 : vector<8x128xf32>
    %c240 = arith.constant 240 : index
    %c0_206 = arith.constant 0 : index
    %463 = vector.load %arg3[%c240, %c0_206] : memref<288x1xf32, #tpu.memory_space<vmem>>, vector<8x1xf32>
    %464 = vector.broadcast %463 : vector<8x1xf32> to vector<8x128xf32>
    %465 = arith.mulf %462, %464 : vector<8x128xf32>
    %466 = arith.mulf %333, %459 : vector<8x128xf32>
    %467 = arith.mulf %348, %465 : vector<8x128xf32>
    %468 = arith.addf %466, %467 : vector<8x128xf32>
    %c48_207 = arith.constant 48 : index
    %c0_208 = arith.constant 0 : index
    %469 = vector.load %arg2[%c48_207, %c0_208] : memref<96x1xf32, #tpu.memory_space<vmem>>, vector<8x1xf32>
    %470 = vector.broadcast %469 : vector<8x1xf32> to vector<8x128xf32>
    %471 = arith.subf %0, %470 : vector<8x128xf32>
    %c240_209 = arith.constant 240 : index
    %c0_210 = arith.constant 0 : index
    %472 = vector.load %arg3[%c240_209, %c0_210] : memref<288x1xf32, #tpu.memory_space<vmem>>, vector<8x1xf32>
    %473 = vector.broadcast %472 : vector<8x1xf32> to vector<8x128xf32>
    %474 = arith.mulf %471, %473 : vector<8x128xf32>
    %c80_211 = arith.constant 80 : index
    %c0_212 = arith.constant 0 : index
    %475 = vector.load %arg2[%c80_211, %c0_212] : memref<96x1xf32, #tpu.memory_space<vmem>>, vector<8x1xf32>
    %476 = vector.broadcast %475 : vector<8x1xf32> to vector<8x128xf32>
    %477 = arith.subf %476, %0 : vector<8x128xf32>
    %c248 = arith.constant 248 : index
    %c0_213 = arith.constant 0 : index
    %478 = vector.load %arg3[%c248, %c0_213] : memref<288x1xf32, #tpu.memory_space<vmem>>, vector<8x1xf32>
    %479 = vector.broadcast %478 : vector<8x1xf32> to vector<8x128xf32>
    %480 = arith.mulf %477, %479 : vector<8x128xf32>
    %481 = arith.mulf %348, %474 : vector<8x128xf32>
    %482 = arith.mulf %363, %480 : vector<8x128xf32>
    %483 = arith.addf %481, %482 : vector<8x128xf32>
    %c56_214 = arith.constant 56 : index
    %c0_215 = arith.constant 0 : index
    %484 = vector.load %arg2[%c56_214, %c0_215] : memref<96x1xf32, #tpu.memory_space<vmem>>, vector<8x1xf32>
    %485 = vector.broadcast %484 : vector<8x1xf32> to vector<8x128xf32>
    %486 = arith.subf %0, %485 : vector<8x128xf32>
    %c248_216 = arith.constant 248 : index
    %c0_217 = arith.constant 0 : index
    %487 = vector.load %arg3[%c248_216, %c0_217] : memref<288x1xf32, #tpu.memory_space<vmem>>, vector<8x1xf32>
    %488 = vector.broadcast %487 : vector<8x1xf32> to vector<8x128xf32>
    %489 = arith.mulf %486, %488 : vector<8x128xf32>
    %c88_218 = arith.constant 88 : index
    %c0_219 = arith.constant 0 : index
    %490 = vector.load %arg2[%c88_218, %c0_219] : memref<96x1xf32, #tpu.memory_space<vmem>>, vector<8x1xf32>
    %491 = vector.broadcast %490 : vector<8x1xf32> to vector<8x128xf32>
    %492 = arith.subf %491, %0 : vector<8x128xf32>
    %c256 = arith.constant 256 : index
    %c0_220 = arith.constant 0 : index
    %493 = vector.load %arg3[%c256, %c0_220] : memref<288x1xf32, #tpu.memory_space<vmem>>, vector<8x1xf32>
    %494 = vector.broadcast %493 : vector<8x1xf32> to vector<8x128xf32>
    %495 = arith.mulf %492, %494 : vector<8x128xf32>
    %496 = arith.mulf %363, %489 : vector<8x128xf32>
    %497 = arith.mulf %378, %495 : vector<8x128xf32>
    %498 = arith.addf %496, %497 : vector<8x128xf32>
    %c0_221 = arith.constant 0 : index
    %c0_222 = arith.constant 0 : index
    %499 = vector.load %arg7[%c0_221, %c0_222] : memref<64x128xf32, #tpu.memory_space<vmem>>, vector<8x128xf32>
    tpu.vector_store %arg7[%c0_221, %c0_222], %393 {strides = array<i32>} : memref<64x128xf32, #tpu.memory_space<vmem>>, vector<8x128xf32>,
    %c8_223 = arith.constant 8 : index
    %c0_224 = arith.constant 0 : index
    %500 = vector.load %arg7[%c8_223, %c0_224] : memref<64x128xf32, #tpu.memory_space<vmem>>, vector<8x128xf32>
    tpu.vector_store %arg7[%c8_223, %c0_224], %408 {strides = array<i32>} : memref<64x128xf32, #tpu.memory_space<vmem>>, vector<8x128xf32>,
    %c16_225 = arith.constant 16 : index
    %c0_226 = arith.constant 0 : index
    %501 = vector.load %arg7[%c16_225, %c0_226] : memref<64x128xf32, #tpu.memory_space<vmem>>, vector<8x128xf32>
    tpu.vector_store %arg7[%c16_225, %c0_226], %423 {strides = array<i32>} : memref<64x128xf32, #tpu.memory_space<vmem>>, vector<8x128xf32>,
    %c24_227 = arith.constant 24 : index
    %c0_228 = arith.constant 0 : index
    %502 = vector.load %arg7[%c24_227, %c0_228] : memref<64x128xf32, #tpu.memory_space<vmem>>, vector<8x128xf32>
    tpu.vector_store %arg7[%c24_227, %c0_228], %438 {strides = array<i32>} : memref<64x128xf32, #tpu.memory_space<vmem>>, vector<8x128xf32>,
    %c32_229 = arith.constant 32 : index
    %c0_230 = arith.constant 0 : index
    %503 = vector.load %arg7[%c32_229, %c0_230] : memref<64x128xf32, #tpu.memory_space<vmem>>, vector<8x128xf32>
    tpu.vector_store %arg7[%c32_229, %c0_230], %453 {strides = array<i32>} : memref<64x128xf32, #tpu.memory_space<vmem>>, vector<8x128xf32>,
    %c40_231 = arith.constant 40 : index
    %c0_232 = arith.constant 0 : index
    %504 = vector.load %arg7[%c40_231, %c0_232] : memref<64x128xf32, #tpu.memory_space<vmem>>, vector<8x128xf32>
    tpu.vector_store %arg7[%c40_231, %c0_232], %468 {strides = array<i32>} : memref<64x128xf32, #tpu.memory_space<vmem>>, vector<8x128xf32>,
    %c48_233 = arith.constant 48 : index
    %c0_234 = arith.constant 0 : index
    %505 = vector.load %arg7[%c48_233, %c0_234] : memref<64x128xf32, #tpu.memory_space<vmem>>, vector<8x128xf32>
    tpu.vector_store %arg7[%c48_233, %c0_234], %483 {strides = array<i32>} : memref<64x128xf32, #tpu.memory_space<vmem>>, vector<8x128xf32>,
    %c56_235 = arith.constant 56 : index
    %c0_236 = arith.constant 0 : index
    %506 = vector.load %arg7[%c56_235, %c0_236] : memref<64x128xf32, #tpu.memory_space<vmem>>, vector<8x128xf32>
    tpu.vector_store %arg7[%c56_235, %c0_236], %498 {strides = array<i32>} : memref<64x128xf32, #tpu.memory_space<vmem>>, vector<8x128xf32>,
    %c0_237 = arith.constant 0 : index
    %c0_238 = arith.constant 0 : index
    %507 = vector.load %arg5[%c0_237, %c0_238] : memref<128x64xbf16, #tpu.memory_space<vmem>>, vector<128x64xbf16>
    %c0_239 = arith.constant 0 : index
    %c0_240 = arith.constant 0 : index
    %508 = vector.load %arg7[%c0_239, %c0_240] : memref<64x128xf32, #tpu.memory_space<vmem>>, vector<64x128xf32>
    %509 = arith.truncf %508 : vector<64x128xf32> to vector<64x128xbf16>
    %cst_241 = arith.constant dense<0.000000e+00> : vector<128x128xf32>
    %510 = tpu.matmul %507, %509, %cst_241 {dimension_numbers = #tpu.dot_dimension_numbers<[1], [0], [0], [1], [0, 0, 1, 1], [], []>} : vector<128x64xbf16>, vector<64x128xbf16>, vector<128x128xf32> -> vector<128x128xf32>
    %c0_242 = arith.constant 0 : index
    %c0_243 = arith.constant 0 : index
    %511 = vector.load %arg4[%c0_242, %c0_243] : memref<128x8xf32, #tpu.memory_space<vmem>>, vector<128x8xf32>
    %cst_244 = arith.constant dense<0.000000e+00> : vector<128x128xf32>
    %512 = tpu.matmul %511, %0, %cst_244 {dimension_numbers = #tpu.dot_dimension_numbers<[1], [0], [0], [1], [0, 0, 1, 1], [], []>} : vector<128x8xf32>, vector<8x128xf32>, vector<128x128xf32> -> vector<128x128xf32>
    %513 = arith.negf %512 : vector<128x128xf32>
    %514 = math.exp %513 : vector<128x128xf32>
    %cst_245 = arith.constant 1.000000e+00 : f32
    %515 = vector.broadcast %cst_245 : f32 to vector<128x128xf32>
    %516 = arith.addf %515, %514 : vector<128x128xf32>
    %517 = arith.divf %515, %516 : vector<128x128xf32>
    %518 = arith.mulf %512, %517 : vector<128x128xf32>
    %cst_246 = arith.constant 1.000000e+00 : f32
    %519 = vector.broadcast %cst_246 : f32 to vector<128x128xf32>
    %520 = arith.mulf %519, %518 : vector<128x128xf32>
    %cst_247 = arith.constant 1.000000e+00 : f32
    %521 = vector.broadcast %cst_247 : f32 to vector<128x128xf32>
    %522 = arith.mulf %521, %510 : vector<128x128xf32>
    %523 = arith.addf %520, %522 : vector<128x128xf32>
    %c0_248 = arith.constant 0 : index
    %c0_249 = arith.constant 0 : index
    %524 = vector.load %arg6[%c0_248, %c0_249] : memref<128x128xf32, #tpu.memory_space<vmem>>, vector<128x128xf32>
    tpu.vector_store %arg6[%c0_248, %c0_249], %523 {strides = array<i32>} : memref<128x128xf32, #tpu.memory_space<vmem>>, vector<128x128xf32>,
    return
  }
  func.func @transform_0(%arg0: i32) -> (i32, i32) {
    %c0_i32 = arith.constant 0 : i32
    %c0_i32_0 = arith.constant 0 : i32
    return %c0_i32, %arg0 : i32, i32
  }
  func.func @transform_1(%arg0: i32) -> (i32, i32) {
    %c0_i32 = arith.constant 0 : i32
    %c0_i32_0 = arith.constant 0 : i32
    %c0_i32_1 = arith.constant 0 : i32
    return %c0_i32, %c0_i32_0 : i32, i32
  }
  func.func @transform_2(%arg0: i32) -> (i32, i32) {
    %c0_i32 = arith.constant 0 : i32
    %c0_i32_0 = arith.constant 0 : i32
    %c0_i32_1 = arith.constant 0 : i32
    return %c0_i32, %c0_i32_0 : i32, i32
  }
  func.func @transform_3(%arg0: i32) -> (i32, i32) {
    %c0_i32 = arith.constant 0 : i32
    %c0_i32_0 = arith.constant 0 : i32
    %c0_i32_1 = arith.constant 0 : i32
    return %c0_i32, %c0_i32_0 : i32, i32
  }
  func.func @transform_4(%arg0: i32) -> (i32, i32) {
    %c0_i32 = arith.constant 0 : i32
    %c0_i32_0 = arith.constant 0 : i32
    %c0_i32_1 = arith.constant 0 : i32
    return %c0_i32, %c0_i32_0 : i32, i32
  }
  func.func @transform_5(%arg0: i32) -> (i32, i32) {
    %c0_i32 = arith.constant 0 : i32
    %c0_i32_0 = arith.constant 0 : i32
    return %c0_i32, %arg0 : i32, i32
  }
}

</mosaic_0001>

<bundles_post_ra>
// kernel: tpu_custom_call.1
= control target key start
LH: loop header
LB: loop body
LE: loop exit
PB: predicated region body
PF: predicated region fallthrough
CT: control target
= control target key end

     0   :  { %v1298_v2 = vmov 0   ;;  %s1844_s0 = inlined_call_operand.vmem [shape: f32[8,128], index: 0, kind: input, shape index: {}]   ;;  %s1845_s1 = inlined_call_operand.vmem [shape: f32[96,1], index: 1, kind: input, shape index: {}]   ;;  %s1846_s2 = inlined_call_operand.vmem [shape: f32[288,1], index: 2, kind: input, shape index: {}]   ;;  %s1847_s3 = inlined_call_operand.vmem [shape: f32[128,8], index: 3, kind: input, shape index: {}]   ;;  %s1848_s4 = inlined_call_operand.vmem [shape: bf16[128,64], index: 4, kind: input, shape index: {}]   ;;  %s1849_s5 = inlined_call_operand.hbm [shape: f32[128,128], index: 5, kind: output, shape index: {}]  }
   0x1   :  { %v50_v0 = vld [vmem:[%s1845_s1 + $0x18] sm:$0xff]  ;;  %v32_v1 = vld [vmem:[%s1845_s1 + $0x8] sm:$0xff]  ;;  %1201 = vset.pattern.permute.xlu1 %v1298_v2  ;;  %1200 = vset.pattern.permute.xlu0 %v1298_v2  ;;  %v59_v3 = vld [vmem:[%s1845_s1 + $0x20] sm:$0xff] }
   0x2   :  { %53 = vperm.xlu1 %1201, %v50_v0   ;;  %35 = vperm.xlu0 %1200, %v32_v1   ;;  %v41_v4 = vld [vmem:[%s1845_s1 + $0x10] sm:$0xff]  ;;  %v68_v5 = vld [vmem:[%s1845_s1 + $0x28] sm:$0xff]  ;;  %v23_v6 = vld [vmem:[%s1845_s1] sm:$0xff] }
   0x3   :  { %v77_v7 = vld [vmem:[%s1845_s1 + $0x30] sm:$0xff]  ;;  %v86_v8 = vld [vmem:[%s1845_s1 + $0x38] sm:$0xff]  ;;  %v154_v9 = vld [vmem:[%s1846_s2] sm:$0xff] }
   0x4   :  { %v162_v10 = vld [vmem:[%s1846_s2 + $0x8] sm:$0xff]  ;;  %v1366_v11 = vld [vmem:[%s1844_s0] sm:$0xff]  ;;  %v175_v12 = vld [vmem:[%s1846_s2 + $0x10] sm:$0xff] }
   0x5   :  { %1169 = vmatprep.subr.mxu1 %v1366_v11  ;;  %v188_v13 = vld [vmem:[%s1846_s2 + $0x18] sm:$0xff] }
   0x6   :  { %62 = vperm.xlu1 %1201, %v59_v3   ;;  %44 = vperm.xlu0 %1200, %v41_v4  }
   0x7   :  { %1170 = vmatpush3.msra.mxu1 %v1366_v11 }
   0xa   :  { %71 = vperm.xlu0 %1200, %v68_v5   ;;  %26 = vperm.xlu1 %1201, %v23_v6  }
   0xe   :  { %80 = vperm.xlu0 %1200, %v77_v7   ;;  %89 = vperm.xlu1 %1201, %v86_v8  }
  0x12   :  { %157 = vperm.xlu0 %1200, %v154_v9   ;;  %165 = vperm.xlu1 %1201, %v162_v10  }
  0x13   :  { %10 = vsyncpa [#allocation4], 0  ;;  %v201_v14 = vld [vmem:[%s1846_s2 + $0x20] sm:$0xff]  ;;  %v104_v16 = vld [vmem:[%s1845_s1 + $0x48] sm:$0xff]  ;;  %vm702_vm0 = vcmask 64512   ;;  %vm564_vm1 = vcmask 523264  }
  0x14   :  { %v95_v15 = vld [vmem:[%s1845_s1 + $0x40] sm:$0xff]  ;;  %v214_v17 = vld [vmem:[%s1846_s2 + $0x28] sm:$0xff]  ;;  %v227_v18 = vld [vmem:[%s1846_s2 + $0x30] sm:$0xff] }
  0x15   :  { %v289_v19 = vld [vmem:[%s1846_s2 + $0x60] sm:$0xff]  ;;  %v296_v20 = vld [vmem:[%s1846_s2 + $0x68] sm:$0xff]  ;;  %v307_v21 = vld [vmem:[%s1846_s2 + $0x70] sm:$0xff] }
  0x16   :  { %178 = vperm.xlu0 %1200, %v175_v12   ;;  %191 = vperm.xlu1 %1201, %v188_v13   ;;  %v686_v22 = vld [vmem:[%s1847_s3] sm:$0xff]  ;;  %v687_v23 = vld [vmem:[%s1847_s3 + $0x8] sm:$0xff]  ;;  %v318_v24 = vld [vmem:[%s1846_s2 + $0x78] sm:$0xff] }
  0x17   :  { %1171 = vmatprep.mubr.msk.f32.mxu1 %vm702_vm0, %v686_v22  ;;  %v113_v25 = vld [vmem:[%s1845_s1 + $0x50] sm:$0xff]  ;;  %v689_v27 = vld [vmem:[%s1847_s3 + $0x18] sm:$0xff]  ;;  %v690_v30 = vld [vmem:[%s1847_s3 + $0x20] sm:$0xff] }
  0x18   :  { %1172 = vmatmul.mubr.msk.f32.vlgmr.msra.gmra.mrb[0].mxu1 %vm702_vm0, %v687_v23  ;;  %v688_v26 = vld [vmem:[%s1847_s3 + $0x10] sm:$0xff]  ;;  %v122_v28 = vld [vmem:[%s1845_s1 + $0x58] sm:$0xff]  ;;  %v691_v31 = vld [vmem:[%s1847_s3 + $0x28] sm:$0xff] }
  0x19   :  { %1174 = vmatprep.mubr.msk.f32.mxu1 %vm702_vm0, %v688_v26  ;;  %v240_v29 = vld [vmem:[%s1846_s2 + $0x38] sm:$0xff]  ;;  %v253_v32 = vld [vmem:[%s1846_s2 + $0x40] sm:$0xff]  ;;  %v692_v34 = vld [vmem:[%s1847_s3 + $0x30] sm:$0xff] }
  0x1a   :  { %204 = vperm.xlu0 %1200, %v201_v14   ;;  %98 = vperm.xlu1 %1201, %v95_v15   ;;  %v329_v33 = vld [vmem:[%s1846_s2 + $0x80] sm:$0xff]  ;;  %v693_v35 = vld [vmem:[%s1847_s3 + $0x38] sm:$0xff]  ;;  %v340_v36 = vld [vmem:[%s1846_s2 + $0x88] sm:$0xff]  ;;  %v1299_v15 = vmov 0.0  }
  0x1b   :  { %v394_v37 = vld [vmem:[%s1846_s2 + $0xc0] sm:$0xff]  ;;  %v695_v39 = vld [vmem:[%s1847_s3 + $0x48] sm:$0xff]  ;;  %v412_v41 = vld [vmem:[%s1846_s2 + $0xd0] sm:$0xff] }
  0x1c   :  { %1175 = vmatmul.mubr.msk.f32.gmra.mrb[2].mxu1 %vm702_vm0, %v689_v27  ;;  %v694_v38 = vld [vmem:[%s1847_s3 + $0x40] sm:$0xff]  ;;  %v401_v40 = vld [vmem:[%s1846_s2 + $0xc8] sm:$0xff]  ;;  %v696_v42 = vld [vmem:[%s1847_s3 + $0x50] sm:$0xff] }
  0x1d   :  { %1177 = vmatprep.mubr.msk.f32.mxu1 %vm702_vm0, %v690_v30  ;;  %v697_v43 = vld [vmem:[%s1847_s3 + $0x58] sm:$0xff]  ;;  %v266_v44 = vld [vmem:[%s1846_s2 + $0x48] sm:$0xff]  ;;  %v279_v45 = vld [vmem:[%s1846_s2 + $0x50] sm:$0xff] }
  0x1e   :  { %107 = vperm.xlu0 %1200, %v104_v16   ;;  %217 = vperm.xlu1 %1201, %v214_v17   ;;  %v698_v46 = vld [vmem:[%s1847_s3 + $0x60] sm:$0xff]  ;;  %v699_v47 = vld [vmem:[%s1847_s3 + $0x68] sm:$0xff]  ;;  %v351_v48 = vld [vmem:[%s1846_s2 + $0x90] sm:$0xff] }
  0x1f   :  { %v362_v49 = vld [vmem:[%s1846_s2 + $0x98] sm:$0xff]  ;;  %v700_v50 = vld [vmem:[%s1847_s3 + $0x70] sm:$0xff]  ;;  %v434_v53 = vld [vmem:[%s1846_s2 + $0xe0] sm:$0xff] }
  0x20   :  { %1178 = vmatmul.mubr.msk.f32.gmra.mrb[4].mxu1 %vm702_vm0, %v691_v31  ;;  %v701_v51 = vld [vmem:[%s1847_s3 + $0x78] sm:$0xff]  ;;  %v373_v54 = vld [vmem:[%s1846_s2 + $0xa0] sm:$0xff]  ;;  %v384_v55 = vld [vmem:[%s1846_s2 + $0xa8] sm:$0xff] }
  0x21   :  { %1180 = vmatprep.mubr.msk.f32.mxu1 %vm702_vm0, %v692_v34  ;;  %v423_v52 = vld [vmem:[%s1846_s2 + $0xd8] sm:$0xff]  ;;  %v445_v56 = vld [vmem:[%s1846_s2 + $0xe8] sm:$0xff]  ;;  %v456_v57 = vld [vmem:[%s1846_s2 + $0xf0] sm:$0xff] }
  0x22   :  { %230 = vperm.xlu0 %1200, %v227_v18   ;;  %292 = vperm.xlu1 %1201, %v289_v19   ;;  %v467_v58 = vld [vmem:[%s1846_s2 + $0xf8] sm:$0xff]  ;;  %v478_v59 = vld [vmem:[%s1846_s2 + $0x100] sm:$0xff] }
  0x23   :  { %v1202_v60 = vld [vmem:[%s1848_s4] sm:$0xff]  }
  0x24   :  { %1181 = vmatmul.mubr.msk.f32.gmra.mrb[6].mxu1 %vm702_vm0, %v693_v35  ;;  %1153 = vmatprep.mubr.msk.bf16.mxu0 %vm564_vm1, %v1202_v60 }
  0x25   :  { %1183 = vmatprep.mubr.msk.f32.mxu1 %vm702_vm0, %v694_v38 }
  0x26   :  { %299 = vperm.xlu0 %1200, %v296_v20   ;;  %310 = vperm.xlu1 %1201, %v307_v21  }
  0x28   :  { %1184 = vmatmul.mubr.msk.f32.gmra.mrb[8].mxu1 %vm702_vm0, %v695_v39 }
  0x29   :  { %1186 = vmatprep.mubr.msk.f32.mxu1 %vm702_vm0, %v696_v42 }
  0x2a   :  { %321 = vperm.xlu0 %1200, %v318_v24   ;;  %116 = vperm.xlu1 %1201, %v113_v25  }
  0x2c   :  { %1187 = vmatmul.mubr.msk.f32.gmra.mrb[10].mxu1 %vm702_vm0, %v697_v43 }
  0x2d   :  { %1189 = vmatprep.mubr.msk.f32.mxu1 %vm702_vm0, %v698_v46 }
  0x2e   :  { %125 = vperm.xlu0 %1200, %v122_v28   ;;  %243 = vperm.xlu1 %1201, %v240_v29  }
  0x30   :  { %1190 = vmatmul.mubr.msk.f32.gmra.mrb[12].mxu1 %vm702_vm0, %v699_v47 }
  0x31   :  { %1192 = vmatprep.mubr.msk.f32.mxu1 %vm702_vm0, %v700_v50 }
  0x32   :  { %256 = vperm.xlu0 %1200, %v253_v32   ;;  %332 = vperm.xlu1 %1201, %v329_v33  }
  0x34   :  { %1193 = vmatmul.mubr.msk.f32.gmra.mrb[14].mxu1 %vm702_vm0, %v701_v51 }
  0x36   :  { %343 = vperm.xlu0 %1200, %v340_v36   ;;  %397 = vperm.xlu1 %1201, %v394_v37  }
  0x3a   :  { %404 = vperm.xlu0 %1200, %v401_v40   ;;  %415 = vperm.xlu1 %1201, %v412_v41  }
  0x3e   :  { %269 = vperm.xlu0 %1200, %v266_v44   ;;  %282 = vperm.xlu1 %1201, %v279_v45  }
  0x42   :  { %354 = vperm.xlu0 %1200, %v351_v48   ;;  %365 = vperm.xlu1 %1201, %v362_v49  }
  0x46   :  { %426 = vperm.xlu0 %1200, %v423_v52   ;;  %437 = vperm.xlu1 %1201, %v434_v53  }
  0x4a   :  { %376 = vperm.xlu0 %1200, %v373_v54   ;;  %387 = vperm.xlu1 %1201, %v384_v55  }
  0x4e   :  { %448 = vperm.xlu0 %1200, %v445_v56   ;;  %459 = vperm.xlu1 %1201, %v456_v57  }
  0x52   :  { %470 = vperm.xlu0 %1200, %v467_v58   ;;  %481 = vperm.xlu1 %1201, %v478_v59  }
  0x81   :  { %v54_v61 = vpop.permute.xlu1 %53  ;;  %v36_v62 = vpop.permute.xlu0 %35 }
  0x82   :  { %vm56_vm3 = vcmp.ge.f32.partialorder %v1366_v11, %v54_v61  ;;  %vm38_vm4 = vcmp.ge.f32.partialorder %v1366_v11, %v36_v62  ;;  %v1550_v14 = vsub.f32 %v54_v61, %v1366_v11  ;;  %v1563_v21 = vsub.f32 %v1366_v11, %v54_v61 }
  0x83   :  { %v1059_v19 = vsel %vm56_vm3, 1.0, %v1299_v15  ;;  %v1057_v20 = vsel %vm38_vm4, 1.0, %v1299_v15  ;;  %v1566_v22 = vsub.f32 %v1366_v11, %v36_v62 }
  0x84   :  { %v135_v27 = vsub.f32 1.0, %v1059_v19  ;;  %v131_v28 = vsub.f32 1.0, %v1057_v20 }
  0x85   :  { %v63_v63 = vpop.permute.xlu1 %62  ;;  %v45_v0 = vpop.permute.xlu0 %44 }
  0x86   :  { %vm47_vm2 = vcmp.ge.f32.partialorder %v1366_v11, %v45_v0  ;;  %vm65_vm5 = vcmp.ge.f32.partialorder %v1366_v11, %v63_v63  ;;  %v161_v25 = vsub.f32 %v45_v0, %v1366_v11  ;;  %v1587_v38 = vsub.f32 %v63_v63, %v1366_v11 }
  0x87   :  { %v1058_v16 = vsel %vm47_vm2, 1.0, %v1299_v15  ;;  %v1060_v23 = vsel %vm65_vm5, 1.0, %v1299_v15  ;;  %v1590_v39 = vsub.f32 %v1366_v11, %v63_v63  ;;  %v1593_v40 = vsub.f32 %v1366_v11, %v45_v0 }
  0x88   :  { %v133_v24 = vsub.f32 1.0, %v1058_v16  ;;  %v137_v37 = vsub.f32 1.0, %v1060_v23  ;;  %v136_v41 = vmul.f32 %v1058_v16, %v135_v27 }
  0x89   :  { %v72_v1 = vpop.permute.xlu0 %71  ;;  %v27_v2 = vpop.permute.xlu1 %26 }
  0x8a   :  { %vm74_vm6 = vcmp.ge.f32.partialorder %v1366_v11, %v72_v1  ;;  %vm29_vm7 = vcmp.ge.f32.partialorder %v1366_v11, %v27_v2  ;;  %v1575_v26 = vsub.f32 %v1366_v11, %v27_v2  ;;  %v1596_v42 = vsub.f32 %v72_v1, %v1366_v11 }
  0x8b   :  { %v1061_v29 = vsel %vm74_vm6, 1.0, %v1299_v15  ;;  %v1056_v30 = vsel %vm29_vm7, 1.0, %v1299_v15  ;;  %v134_v44 = vmul.f32 %v1057_v20, %v133_v24  ;;  %v1599_v46 = vsub.f32 %v1366_v11, %v72_v1 }
  0x8c   :  { %v132_v43 = vmul.f32 %v1056_v30, %v131_v28  ;;  %v139_v45 = vsub.f32 1.0, %v1061_v29  ;;  %v138_v57 = vmul.f32 %v1059_v19, %v137_v37 }
  0x8d   :  { %v1534_v3 = vpop.permute.xlu0 %80  ;;  %v1536_v4 = vpop.permute.xlu1 %89 }
  0x8e   :  { %vm83_vm8 = vcmp.ge.f32.partialorder %v1366_v11, %v1534_v3  ;;  %vm92_vm9 = vcmp.ge.f32.partialorder %v1366_v11, %v1536_v4  ;;  %v1610_v55 = vsub.f32 %v1534_v3, %v1366_v11  ;;  %v1616_v59 = vsub.f32 %v1366_v11, %v1534_v3 }
  0x8f   :  { %v1062_v33 = vsel %vm83_vm8, 1.0, %v1299_v15  ;;  %v1583_v34 = vsel %vm92_vm9, 1.0, %v1299_v15  ;;  %v1625_v62 = vsub.f32 %v1536_v4, %v1366_v11  ;;  %v1629_v63 = vsub.f32 %v1366_v11, %v1536_v4 }
  0x90   :  { %v141_v47 = vsub.f32 1.0, %v1062_v33  ;;  %v143_v48 = vsub.f32 1.0, %v1583_v34  ;;  %v140_v0 = vmul.f32 %v1060_v23, %v139_v45 }
  0x91   :  { %v158_v5 = vpop.permute.xlu0 %157  ;;  %v166_v6 = vpop.permute.xlu1 %165 }
  0x92   :  { %v160_v35 = vmul.f32 %v158_v5, %v1575_v26  ;;  %v168_v36 = vmul.f32 %v166_v6, %v161_v25  ;;  %v173_v53 = vmul.f32 %v1566_v22, %v166_v6  ;;  %v142_v1 = vmul.f32 %v1061_v29, %v141_v47 }
  0x94   :  { %v169_v51 = vmul.f32 %v160_v35, %v132_v43  ;;  %v170_v52 = vmul.f32 %v168_v36, %v134_v44  ;;  %v182_v5 = vmul.f32 %v173_v53, %v134_v44 }
  0x95   :  { %v179_v7 = vpop.permute.xlu0 %178  ;;  %v192_v8 = vpop.permute.xlu1 %191 }
  0x96   :  { %v181_v54 = vmul.f32 %v179_v7, %v1550_v14  ;;  %v186_v56 = vmul.f32 %v1593_v40, %v179_v7  ;;  %v194_v58 = vmul.f32 %v192_v8, %v1587_v38  ;;  %v199_v60 = vmul.f32 %v1563_v21, %v192_v8 }
  0x97   :  { %v1635_v7 = vmul.f32 %v1062_v33, %v143_v48  ;;  %v171_v8 = vadd.f32 %v170_v52, %v169_v51 }
  0x98   :  { %v183_v6 = vmul.f32 %v181_v54, %v136_v41  ;;  %v195_v16 = vmul.f32 %v186_v56, %v136_v41  ;;  %v196_v19 = vmul.f32 %v194_v58, %v138_v57  ;;  %v208_v4 = vmul.f32 %v199_v60, %v138_v57 }
  0x99   :  { %v1538_v9 = vpop.permute.xlu0 %204  ;;  %v1540_v10 = vpop.permute.xlu1 %98 }
  0x9a   :  { %v207_v61 = vmul.f32 %v1538_v9, %v1596_v42  ;;  %vm101_vm10 = vcmp.ge.f32.partialorder %v1366_v11, %v1540_v10  ;;  %v212_v23 = vmul.f32 %v1590_v39, %v1538_v9  ;;  %v1644_v25 = vsub.f32 %v1540_v10, %v1366_v11 }
  0x9b   :  { %v1064_v20 = vsel %vm101_vm10, 1.0, %v1299_v15  ;;  %v1648_v27 = vsub.f32 %v1366_v11, %v1540_v10  ;;  %v184_v37 = vadd.f32 %v183_v6, %v182_v5  ;;  %v197_v43 = vadd.f32 %v196_v19, %v195_v16 }
  0x9c   :  { %v209_v24 = vmul.f32 %v207_v61, %v140_v0  ;;  %v145_v36 = vsub.f32 1.0, %v1064_v20  ;;  %v221_v44 = vmul.f32 %v212_v23, %v140_v0 }
  0x9d   :  { %v1542_v12 = vpop.permute.xlu0 %107  ;;  %v1544_v13 = vpop.permute.xlu1 %217 }
  0x9e   :  { %vm110_vm11 = vcmp.ge.f32.partialorder %v1366_v11, %v1542_v12  ;;  %v220_v10 = vmul.f32 %v1544_v13, %v1610_v55  ;;  %v1669_v45 = vsub.f32 %v1542_v12, %v1366_v11  ;;  %v210_v48 = vadd.f32 %v209_v24, %v208_v4 }
  0x9f   :  { %v1657_v9 = vsel %vm110_vm11, 1.0, %v1299_v15  ;;  %v146_v58 = vmul.f32 %v1583_v34, %v145_v36 }
  0xa0   :  { %v147_v51 = vsub.f32 1.0, %v1657_v9  ;;  %v222_v60 = vmul.f32 %v220_v10, %v142_v1 }
  0xa1   :  { %v1554_v17 = vpop.permute.xlu0 %230  ;;  %v1556_v18 = vpop.permute.xlu1 %292 }
  0xa2   :  { %v238_v5 = vmul.f32 %v1616_v59, %v1554_v17  ;;  %v148_v4 = vmul.f32 %v1064_v20, %v147_v51 }
  0xa5   :  { %v300_v31 = vpop.permute.xlu0 %299  ;;  %v1579_v32 = vpop.permute.xlu1 %310 }
  0xa6   :  { %v302_v28 = vmul.f32 %v300_v31, %v1550_v14  ;;  %v306_v29 = vmul.f32 %v300_v31, %v1566_v22  ;;  %v313_v30 = vmul.f32 %v1579_v32, %v1587_v38  ;;  %v225_v14 = vmul.f32 %v1599_v46, %v1544_v13 }
  0xa7   :  { %v295_v31 = vmul.f32 %v1556_v18, %v1575_v26  ;;  %v317_v47 = vmul.f32 %v1579_v32, %v1593_v40  ;;  %v276_v18 = vsub.f32 %v1366_v11, %v1542_v12  ;;  %v233_v32 = vmul.f32 %v1554_v17, %v1625_v62 }
  0xa8   :  { %v304_v52 = vmul.f32 %v302_v28, %v184_v37  ;;  %v314_v53 = vmul.f32 %v306_v29, %v184_v37  ;;  %v315_v54 = vmul.f32 %v313_v30, %v197_v43  ;;  %v234_v61 = vmul.f32 %v225_v14, %v142_v1 }
  0xa9   :  { %v1602_v49 = vpop.permute.xlu0 %321  ;;  %v1604_v50 = vpop.permute.xlu1 %116  ;;  %v303_v0 = vmul.f32 %v295_v31, %v171_v8  ;;  %v325_v6 = vmul.f32 %v317_v47, %v197_v43  ;;  %v235_v30 = vmul.f32 %v233_v32, %v1635_v7  ;;  %v223_v31 = vadd.f32 %v222_v60, %v221_v44 }
  0xaa   :  { %v324_v41 = vmul.f32 %v1602_v49, %v1596_v42  ;;  %vm119_vm12 = vcmp.ge.f32.partialorder %v1366_v11, %v1604_v50  ;;  %v316_v23 = vadd.f32 %v315_v54, %v314_v53  ;;  %v247_v54 = vmul.f32 %v238_v5, %v1635_v7 }
  0xab   :  { %v1066_v19 = vsel %vm119_vm12, 1.0, %v1299_v15  ;;  %v305_v24 = vadd.f32 %v304_v52, %v303_v0  ;;  %v1706_v44 = vsub.f32 %v1604_v50, %v1366_v11 }
  0xac   :  { %v326_v57 = vmul.f32 %v324_v41, %v210_v48 }
  0xad   :  { %v1631_v2 = vpop.permute.xlu0 %125  ;;  %v1633_v3 = vpop.permute.xlu1 %243 }
  0xae   :  { %vm128_vm13 = vcmp.ge.f32.partialorder %v1366_v11, %v1631_v2  ;;  %v327_v29 = vadd.f32 %v326_v57, %v325_v6  ;;  %v236_v57 = vadd.f32 %v235_v30, %v234_v61  ;;  %v1712_v6 = vsub.f32 %v1631_v2, %v1366_v11 }
  0xaf   :  { %v1067_v36 = vsel %vm128_vm13, 1.0, %v1299_v15  ;;  %v251_v15 = vmul.f32 %v1629_v63, %v1633_v3 }
  0xb0   :  { %v151_v51 = vsub.f32 1.0, %v1067_v36 }
  0xb1   :  { %v1654_v33 = vpop.permute.xlu0 %256  ;;  %v333_v35 = vpop.permute.xlu1 %332  ;;  %v260_v61 = vmul.f32 %v251_v15, %v146_v58 }
  0xb2   :  { %v335_v20 = vmul.f32 %v333_v35, %v1610_v55  ;;  %v259_v52 = vmul.f32 %v1654_v33, %v1669_v45  ;;  %v264_v32 = vmul.f32 %v1648_v27, %v1654_v33  ;;  %v152_v50 = vmul.f32 %v1066_v19, %v151_v51 }
  0xb4   :  { %v337_v0 = vmul.f32 %v335_v20, %v223_v31 }
  0xb5   :  { %v344_v56 = vpop.permute.xlu0 %343  ;;  %v398_v13 = vpop.permute.xlu1 %397 }
  0xb6   :  { %v400_v16 = vmul.f32 %v398_v13, %v1575_v26  ;;  %v246_v26 = vmul.f32 %v1633_v3, %v1644_v25  ;;  %v339_v13 = vmul.f32 %v333_v35, %v1590_v39 }
  0xb8   :  { %v408_v37 = vmul.f32 %v400_v16, %v305_v24  ;;  %v248_v60 = vmul.f32 %v246_v26, %v146_v58  ;;  %v261_v24 = vmul.f32 %v259_v52, %v148_v4 }
  0xb9   :  { %v405_v34 = vpop.permute.xlu0 %404  ;;  %v416_v1 = vpop.permute.xlu1 %415 }
  0xba   :  { %v407_v28 = vmul.f32 %v405_v34, %v1587_v38  ;;  %v411_v8 = vmul.f32 %v405_v34, %v1566_v22  ;;  %v418_v17 = vmul.f32 %v416_v1, %v1596_v42  ;;  %v328_v38 = vmul.f32 %v1602_v49, %v1563_v21 }
  0xbb   :  { %v149_v22 = vsub.f32 1.0, %v1066_v19  ;;  %v346_v42 = vmul.f32 %v344_v56, %v1625_v62  ;;  %v422_v33 = vmul.f32 %v416_v1, %v1593_v40 }
  0xbc   :  { %v409_v41 = vmul.f32 %v407_v28, %v316_v23  ;;  %v419_v10 = vmul.f32 %v411_v8, %v316_v23  ;;  %v420_v14 = vmul.f32 %v418_v17, %v327_v29  ;;  %v336_v3 = vmul.f32 %v328_v38, %v210_v48 }
  0xbd   :  { %v270_v43 = vpop.permute.xlu0 %269  ;;  %v283_v47 = vpop.permute.xlu1 %282  ;;  %v348_v16 = vmul.f32 %v346_v42, %v236_v57  ;;  %v150_v34 = vmul.f32 %v1657_v9, %v149_v22  ;;  %v347_v23 = vmul.f32 %v339_v13, %v223_v31  ;;  %v350_v28 = vmul.f32 %v344_v56, %v1599_v46 }
  0xbe   :  { %v410_v53 = vadd.f32 %v409_v41, %v408_v37  ;;  %v421_v49 = vadd.f32 %v420_v14, %v419_v10  ;;  %v272_v48 = vmul.f32 %v270_v43, %v1706_v44  ;;  %v273_v8 = vmul.f32 %v264_v32, %v148_v4 }
  0xbf   :  { %v277_v2 = vmul.f32 %v276_v18, %v270_v43  ;;  %v249_v17 = vadd.f32 %v248_v60, %v247_v54  ;;  %v338_v58 = vadd.f32 %v337_v0, %v336_v3  ;;  %v285_v30 = vmul.f32 %v283_v47, %v1712_v6 }
  0xc0   :  { %v520_v35 = vpack.c.bf16 %v421_v49, %v410_v53  ;;  %v349_v40 = vadd.f32 %v348_v16, %v347_v23  ;;  %v358_v12 = vmul.f32 %v350_v28, %v236_v57  ;;  %v430_v18 = vmul.f32 %v422_v33, %v327_v29 }
  0xc1   :  { %v355_v7 = vpop.permute.xlu0 %354  ;;  %v366_v5 = vpop.permute.xlu1 %365  ;;  %v274_v20 = vmul.f32 %v272_v48, %v150_v34  ;;  %v262_v37 = vadd.f32 %v261_v24, %v260_v61  ;;  %v286_v41 = vmul.f32 %v277_v2, %v150_v34  ;;  %v287_v22 = vmul.f32 %v285_v30, %v152_v50 }
  0xc2   :  { %1145 = vmatprep.subr.bf16.mxu0 %v520_v35  ;;  %v357_v9 = vmul.f32 %v355_v7, %v1644_v25  ;;  %v361_v19 = vmul.f32 %v355_v7, %v1616_v59  ;;  %v368_v1 = vmul.f32 %v366_v5, %v1669_v45  ;;  %v372_v43 = vmul.f32 %v366_v5, %v1629_v63 }
  0xc3   :  { %1146 = vmatpush3.bf16.msra.mxu0 %v520_v35  ;;  %v275_v52 = vadd.f32 %v274_v20, %v273_v8  ;;  %v288_v49 = vadd.f32 %v287_v22, %v286_v41 }
  0xc4   :  { %v359_v31 = vmul.f32 %v357_v9, %v249_v17  ;;  %v369_v42 = vmul.f32 %v361_v19, %v249_v17 }
  0xc5   :  { %v427_v56 = vpop.permute.xlu0 %426  ;;  %v438_v36 = vpop.permute.xlu1 %437 }
  0xc6   :  { %v429_v4 = vmul.f32 %v427_v56, %v1610_v55  ;;  %v433_v26 = vmul.f32 %v427_v56, %v1563_v21  ;;  %v440_v11 = vmul.f32 %v438_v36, %v1625_v62  ;;  %v370_v55 = vmul.f32 %v368_v1, %v262_v37  ;;  %v1206_v1 = vld [vmem:[%s1848_s4 + $0x20] sm:$0xff]  }
  0xc7   :  { %v444_v29 = vmul.f32 %v438_v36, %v1590_v39  ;;  %v360_v32 = vadd.f32 %v359_v31, %v358_v12  ;;  %v380_v39 = vmul.f32 %v372_v43, %v262_v37 }
  0xc8   :  { %v431_v10 = vmul.f32 %v429_v4, %v338_v58  ;;  %v441_v14 = vmul.f32 %v433_v26, %v338_v58  ;;  %v442_v38 = vmul.f32 %v440_v11, %v349_v40  ;;  %v371_v7 = vadd.f32 %v370_v55, %v369_v42  ;;  %v1207_v4 = vld [vmem:[%s1848_s4 + $0x28] sm:$0xff]   ;;  %v1208_v26 = vld [vmem:[%s1848_s4 + $0x30] sm:$0xff]   ;;  %v1209_v11 = vld [vmem:[%s1848_s4 + $0x38] sm:$0xff]  }
  0xc9   :  { %v377_v47 = vpop.permute.xlu0 %376  ;;  %v388_v51 = vpop.permute.xlu1 %387  ;;  %v452_v35 = vmul.f32 %v444_v29, %v349_v40 }
  0xca   :  { %v432_v15 = vadd.f32 %v431_v10, %v430_v18  ;;  %v443_v21 = vadd.f32 %v442_v38, %v441_v14  ;;  %v379_v62 = vmul.f32 %v377_v47, %v1706_v44  ;;  %v383_v53 = vmul.f32 %v377_v47, %v1648_v27 }
  0xcb   :  { %v390_v54 = vmul.f32 %v388_v51, %v1712_v6 }
  0xcc   :  { %v521_v13 = vpack.c.bf16 %v443_v21, %v432_v15  ;;  %v381_v57 = vmul.f32 %v379_v62, %v275_v52  ;;  %v391_v61 = vmul.f32 %v383_v53, %v275_v52 }
  0xcd   :  { %v449_v60 = vpop.permute.xlu0 %448  ;;  %v460_v0 = vpop.permute.xlu1 %459  ;;  %v392_v27 = vmul.f32 %v390_v54, %v288_v49 }
  0xce   :  { %v451_v3 = vmul.f32 %v449_v60, %v1644_v25  ;;  %v455_v16 = vmul.f32 %v449_v60, %v1599_v46  ;;  %v462_v5 = vmul.f32 %v460_v0, %v1669_v45  ;;  %1147 = vmatprep.subr.bf16.mxu0 %v521_v13  ;;  %v466_v23 = vmul.f32 %v460_v0, %v1616_v59 }
  0xcf   :  { %1148 = vmatpush3.bf16.msra.mxu0 %v521_v13  ;;  %v382_v33 = vadd.f32 %v381_v57, %v380_v39  ;;  %v393_v2 = vadd.f32 %v392_v27, %v391_v61 }
  0xd0   :  { %v453_v24 = vmul.f32 %v451_v3, %v360_v32  ;;  %v463_v34 = vmul.f32 %v455_v16, %v360_v32  ;;  %v464_v50 = vmul.f32 %v462_v5, %v371_v7  ;;  %v474_v58 = vmul.f32 %v466_v23, %v371_v7 }
  0xd1   :  { %v471_v28 = vpop.permute.xlu0 %470  ;;  %v482_v48 = vpop.permute.xlu1 %481 }
  0xd2   :  { %v454_v25 = vadd.f32 %v453_v24, %v452_v35  ;;  %v465_v8 = vadd.f32 %v464_v50, %v463_v34  ;;  %v473_v46 = vmul.f32 %v471_v28, %v1706_v44  ;;  %v477_v45 = vmul.f32 %v471_v28, %v1629_v63  ;;  %v1203_v44 = vld [vmem:[%s1848_s4 + $0x8] sm:$0xff]   ;;  %v1204_v63 = vld [vmem:[%s1848_s4 + $0x10] sm:$0xff]  }
  0xd3   :  { %v484_v17 = vmul.f32 %v482_v48, %v1712_v6  ;;  %v1205_v6 = vld [vmem:[%s1848_s4 + $0x18] sm:$0xff]   ;;  %s1300_s4 = smov [#allocation3]  }
  0xd4   :  { %v475_v30 = vmul.f32 %v473_v46, %v382_v33  ;;  %v485_v9 = vmul.f32 %v477_v45, %v382_v33  ;;  %v522_v19 = vpack.c.bf16 %v465_v8, %v454_v25  ;;  %s1045_s18 = sshll.u32 %s1300_s4, 4  ;;  %s1046_s18 = int_to_ptr.vmem [resolvable:$true] %s1045_s18 }
  0xd5   :  { %v486_v56 = vmul.f32 %v484_v17, %v393_v2  ;;  %s1274_s19 = scalar_lea.vmem %s1046_s18, 2048  ;;  %p1279_p1 = scmp.lt.s32.totalorder %s1046_s18, %s1046_s18 }
  0xd6   :  { %v476_v36 = vadd.f32 %v475_v30, %v474_v58  ;;  %1149 = vmatprep.subr.bf16.mxu0 %v522_v19  ;;  %p1275_p0 = scmp.ne.s32.totalorder %s1046_s18, %s1274_s19  ;;  %p1280_p2 = scmp.lt.s32.totalorder %s1274_s19, %s1274_s19 }
  0xd7   :  { %v487_v59 = vadd.f32 %v486_v56, %v485_v9  ;;  %1150 = vmatpush3.bf16.msra.mxu0 %v522_v19 }
  0xd8   :  { %p1281_p3 = por %p1280_p2, %p1279_p1 }
  0xd9   :  { %v523_v40 = vpack.c.bf16 %v487_v59, %v476_v36 }
  0xda   :  { %p1282_p4 = pnand %p1281_p3, %p1275_p0 }
  0xdb   :  { %1151 = vmatprep.subr.bf16.mxu0 %v523_v40 }
  0xdc   :  { %1152 = vmatpush3.bf16.msra.mxu0 %v523_v40 }
  0xdf   :  { %1154 = vmatmul.mubr.msk.bf16.vlgmr.msra.gmra.mrb[0].mxu0 %vm564_vm1, %v1203_v44 }
  0xe0   :  { %1157 = vmatprep.mubr.msk.bf16.mxu0 %vm564_vm1, %v1204_v63 }
  0xe7   :  { %1158 = vmatmul.mubr.msk.bf16.gmra.mrb[4].mxu0 %vm564_vm1, %v1205_v6 }
  0xe8   :  { %1161 = vmatprep.mubr.msk.bf16.mxu0 %vm564_vm1, %v1206_v1 }
  0xeb   :  { %v1768_v12 = vpop.f32.mrb[0].mxu1 }
  0xec   :  { %v1770_v18 = vpop.f32.mrb[1].mxu1  ;;  %v1101_v52 = vmul.f32 -1.442695, %v1768_v12 }
  0xed   :  { %v1100_v21 = vmul.f32 -1.442695, %v1770_v18 }
  0xef   :  { %1162 = vmatmul.mubr.msk.bf16.gmra.mrb[8].mxu0 %vm564_vm1, %v1207_v4  ;;  %v1772_v20 = vpop.f32.mrb[2].mxu1  ;;  %1210 = vpow2.f32 %v1100_v21 }
  0xf0   :  { %1165 = vmatprep.mubr.msk.bf16.mxu0 %vm564_vm1, %v1208_v26  ;;  %v1774_v37 = vpop.f32.mrb[3].mxu1  ;;  %v1103_v29 = vmul.f32 -1.442695, %v1772_v20 }
  0xf1   :  { %v1102_v62 = vmul.f32 -1.442695, %v1774_v37 }
  0xf3   :  { %v1776_v41 = vpop.f32.mrb[4].mxu1  ;;  %1212 = vpow2.f32 %v1102_v62 }
  0xf4   :  { %v1778_v10 = vpop.f32.mrb[5].mxu1  ;;  %1214 = vpow2.f32 %v1103_v29  ;;  %v1105_v49 = vmul.f32 -1.442695, %v1776_v41 }
  0xf5   :  { %v1104_v53 = vmul.f32 -1.442695, %v1778_v10  ;;  %1216 = vpow2.f32 %v1101_v52 }
  0xf7   :  { %1166 = vmatmul.mubr.msk.bf16.gmra.mrb[12].mxu0 %vm564_vm1, %v1209_v11  ;;  %v1780_v14 = vpop.f32.mrb[6].mxu1  ;;  %1218 = vpow2.f32 %v1104_v53 }
  0xf8   :  { %v1782_v38 = vpop.f32.mrb[7].mxu1  ;;  %v1107_v57 = vmul.f32 -1.442695, %v1780_v14 }
  0xf9   :  { %v1106_v54 = vmul.f32 -1.442695, %v1782_v38  ;;  %v1211_v13 = vpop.eup %1210 }
  0xfa   :  { %v944_v32 = vadd.f32 1.0, %v1211_v13 }
  0xfb   :  { %v1784_v22 = vpop.f32.mrb[8].mxu1  ;;  %1220 = vpow2.f32 %v1106_v54 }
  0xfc   :  { %v1786_v31 = vpop.f32.mrb[9].mxu1  ;;  %1222 = vpow2.f32 %v1107_v57  ;;  %v1109_v0 = vmul.f32 -1.442695, %v1784_v22 }
  0xfd   :  { %v1213_v60 = vpop.eup %1212  ;;  %1224 = vpow2.f32 %v1105_v49  ;;  %v1108_v39 = vmul.f32 -1.442695, %v1786_v31 }
  0xfe   :  { %v946_v3 = vadd.f32 1.0, %v1213_v60  ;;  %v1215_v16 = vpop.eup %1214  ;;  %1226 = vrcp.f32 %v944_v32 }
  0xff   :  { %v1788_v42 = vpop.f32.mrb[10].mxu1  ;;  %v1217_v5 = vpop.eup %1216  ;;  %1228 = vpow2.f32 %v1109_v0  ;;  %v947_v27 = vadd.f32 1.0, %v1215_v16 }
 0x100   :  { %v1790_v43 = vpop.f32.mrb[11].mxu1  ;;  %v1111_v61 = vmul.f32 -1.442695, %v1788_v42  ;;  %1230 = vrcp.f32 %v946_v3  ;;  %v945_v24 = vadd.f32 1.0, %v1217_v5 }
 0x101   :  { %v1110_v7 = vmul.f32 -1.442695, %v1790_v43  ;;  %v1219_v35 = vpop.eup %1218 }
 0x102   :  { %v948_v34 = vadd.f32 1.0, %v1219_v35 }
 0x103   :  { %v1792_v47 = vpop.f32.mrb[12].mxu1  ;;  %1232 = vpow2.f32 %v1110_v7 }
 0x104   :  { %v1794_v51 = vpop.f32.mrb[13].mxu1  ;;  %1234 = vpow2.f32 %v1108_v39  ;;  %v1113_v23 = vmul.f32 -1.442695, %v1792_v47 }
 0x105   :  { %v1221_v50 = vpop.eup %1220  ;;  %1236 = vpow2.f32 %v1111_v61  ;;  %v1112_v28 = vmul.f32 -1.442695, %v1794_v51 }
 0x106   :  { %1238 = vrcp.f32 %v947_v27  ;;  %v1223_v33 = vpop.eup %1222  ;;  %v950_v8 = vadd.f32 1.0, %v1221_v50 }
 0x107   :  { %v1796_v55 = vpop.f32.mrb[14].mxu1  ;;  %1240 = vrcp.f32 %v945_v24  ;;  %v1225_v25 = vpop.eup %1224  ;;  %v951_v2 = vadd.f32 1.0, %v1223_v33 }
 0x108   :  { %v1798_v15 = vpop.f32.mrb[15].mxu1  ;;  %1242 = vrcp.f32 %v948_v34  ;;  %v1115_v46 = vmul.f32 -1.442695, %v1796_v55  ;;  %v1227_v45 = vpop.eup %1226  ;;  %v949_v58 = vadd.f32 1.0, %v1225_v25 }
 0x109   :  { %v1114_v48 = vmul.f32 -1.442695, %v1798_v15  ;;  %1244 = vpow2.f32 %v1113_v23  ;;  %v1229_v17 = vpop.eup %1228  ;;  %v992_v1 = vmul.f32 %v1227_v45, %v1770_v18 }
 0x10a   :  { %1246 = vpow2.f32 %v1112_v28  ;;  %v1231_v30 = vpop.eup %1230  ;;  %v953_v62 = vadd.f32 1.0, %v1229_v17 }
 0x10b   :  { %1248 = vpow2.f32 %v1114_v48  ;;  %v994_v44 = vmul.f32 %v1231_v30, %v1774_v37 }
 0x10c   :  { %1250 = vrcp.f32 %v950_v8 }
 0x10d   :  { %v1233_v9 = vpop.eup %1232  ;;  %1252 = vpow2.f32 %v1115_v46 }
 0x10e   :  { %v1235_v19 = vpop.eup %1234  ;;  %1254 = vrcp.f32 %v951_v2  ;;  %v954_v59 = vadd.f32 1.0, %v1233_v9 }
 0x10f   :  { %v1237_v56 = vpop.eup %1236  ;;  %1256 = vrcp.f32 %v949_v58  ;;  %v952_v63 = vadd.f32 1.0, %v1235_v19 }
 0x110   :  { %v1239_v36 = vpop.eup %1238  ;;  %v955_v4 = vadd.f32 1.0, %v1237_v56  ;;  %1258 = vrcp.f32 %v954_v59 }
 0x111   :  { %v1241_v40 = vpop.eup %1240  ;;  %v995_v21 = vmul.f32 %v1239_v36, %v1772_v20  ;;  %1260 = vrcp.f32 %v952_v63 }
 0x112   :  { %v1243_v6 = vpop.eup %1242  ;;  %v993_v54 = vmul.f32 %v1241_v40, %v1768_v12  ;;  %1262 = vrcp.f32 %v955_v4 }
 0x113   :  { %v1245_v11 = vpop.eup %1244  ;;  %1264 = vrcp.f32 %v953_v62  ;;  %v996_v5 = vmul.f32 %v1243_v6, %v1778_v10 }
 0x114   :  { %v1247_v53 = vpop.eup %1246  ;;  %v957_v27 = vadd.f32 1.0, %v1245_v11 }
 0x115   :  { %v1249_v49 = vpop.eup %1248  ;;  %v956_v7 = vadd.f32 1.0, %v1247_v53 }
 0x116   :  { %v1251_v18 = vpop.eup %1250  ;;  %v958_v3 = vadd.f32 1.0, %v1249_v49 }
 0x117   :  { %v1253_v0 = vpop.eup %1252  ;;  %v998_v12 = vmul.f32 %v1251_v18, %v1782_v38 }
 0x118   :  { %v1255_v20 = vpop.eup %1254  ;;  %v959_v39 = vadd.f32 1.0, %v1253_v0  ;;  %1266 = vrcp.f32 %v958_v3 }
 0x119   :  { %v1257_v16 = vpop.eup %1256  ;;  %v999_v61 = vmul.f32 %v1255_v20, %v1780_v14  ;;  %1268 = vrcp.f32 %v956_v7 }
 0x11a   :  { %v997_v50 = vmul.f32 %v1257_v16, %v1776_v41  ;;  %v1259_v38 = vpop.eup %1258  ;;  %1270 = vrcp.f32 %v959_v39 }
 0x11b   :  { %v1261_v25 = vpop.eup %1260  ;;  %1272 = vrcp.f32 %v957_v27  ;;  %v1002_v46 = vmul.f32 %v1259_v38, %v1790_v43 }
 0x11c   :  { %v1263_v14 = vpop.eup %1262  ;;  %v1000_v41 = vmul.f32 %v1261_v25, %v1786_v31 }
 0x11d   :  { %v1265_v8 = vpop.eup %1264  ;;  %v1003_v2 = vmul.f32 %v1263_v14, %v1788_v42 }
 0x11e   :  { %v1001_v30 = vmul.f32 %v1265_v8, %v1784_v22 }
 0x122   :  { %v1267_v59 = vpop.eup %1266 }
 0x123   :  { %v1006_v63 = vmul.f32 %v1267_v59, %v1798_v15 }
 0x1b2   :  { %v1155_v26 = vpop.f32.mrb[0].mxu0 }
 0x1b3   :  { %v1010_v29 = vadd.f32 %v1155_v26, %v994_v44  ;;  %v623_v52 = vpop.f32.mrb[1].mxu0  ;;  %v1269_v44 = vpop.eup %1268 }
 0x1b4   :  { %v1008_v13 = vadd.f32 %v992_v1, %v623_v52  ;;  %v1156_v57 = vpop.f32.mrb[2].mxu0  ;;  %v1271_v43 = vpop.eup %1270  ;;  %v1004_v42 = vmul.f32 %v1269_v44, %v1794_v51 }
 0x1b5   :  { %1026 = vst [vmem:[#allocation3 + $0x10] sm:$0xff] %v1010_v29  ;;  %v1011_v37 = vadd.f32 %v1156_v57, %v995_v21  ;;  %v626_v60 = vpop.f32.mrb[3].mxu0  ;;  %v1273_v31 = vpop.eup %1272  ;;  %v1007_v22 = vmul.f32 %v1271_v43, %v1796_v55 }
 0x1b6   :  { %1024 = vst [vmem:[#allocation3] sm:$0xff] %v1008_v13  ;;  %v1009_v32 = vadd.f32 %v993_v54, %v626_v60  ;;  %v1005_v26 = vmul.f32 %v1273_v31, %v1792_v47 }
 0x1b7   :  { %1027 = vst [vmem:[#allocation3 + $0x18] sm:$0xff] %v1011_v37 }
 0x1b8   :  { %1025 = vst [vmem:[#allocation3 + $0x8] sm:$0xff] %v1009_v32 }
 0x1ba   :  { %v1159_v35 = vpop.f32.mrb[4].mxu0 }
 0x1bb   :  { %v1014_v24 = vadd.f32 %v1159_v35, %v998_v12  ;;  %v639_v34 = vpop.f32.mrb[5].mxu0 }
 0x1bc   :  { %v1012_v23 = vadd.f32 %v996_v5, %v639_v34  ;;  %v1160_v28 = vpop.f32.mrb[6].mxu0 }
 0x1bd   :  { %1030 = vst [vmem:[#allocation3 + $0x30] sm:$0xff] %v1014_v24  ;;  %v1015_v33 = vadd.f32 %v1160_v28, %v999_v61  ;;  %v642_v48 = vpop.f32.mrb[7].mxu0 }
 0x1be   :  { %1028 = vst [vmem:[#allocation3 + $0x20] sm:$0xff] %v1012_v23  ;;  %v1013_v10 = vadd.f32 %v997_v50, %v642_v48 }
 0x1bf   :  { %1031 = vst [vmem:[#allocation3 + $0x38] sm:$0xff] %v1015_v33 }
 0x1c0   :  { %1029 = vst [vmem:[#allocation3 + $0x28] sm:$0xff] %v1013_v10 }
 0x1c2   :  { %v1163_v45 = vpop.f32.mrb[8].mxu0 }
 0x1c3   :  { %v1018_v17 = vadd.f32 %v1163_v45, %v1002_v46  ;;  %v655_v58 = vpop.f32.mrb[9].mxu0 }
 0x1c4   :  { %v1016_v9 = vadd.f32 %v1000_v41, %v655_v58  ;;  %v1164_v19 = vpop.f32.mrb[10].mxu0 }
 0x1c5   :  { %1034 = vst [vmem:[#allocation3 + $0x50] sm:$0xff] %v1018_v17  ;;  %v1019_v56 = vadd.f32 %v1164_v19, %v1003_v2  ;;  %v658_v36 = vpop.f32.mrb[11].mxu0 }
 0x1c6   :  { %1032 = vst [vmem:[#allocation3 + $0x40] sm:$0xff] %v1016_v9  ;;  %v1017_v40 = vadd.f32 %v1001_v30, %v658_v36 }
 0x1c7   :  { %1035 = vst [vmem:[#allocation3 + $0x58] sm:$0xff] %v1019_v56 }
 0x1c8   :  { %1033 = vst [vmem:[#allocation3 + $0x48] sm:$0xff] %v1017_v40 }
 0x1ca   :  { %v1167_v6 = vpop.f32.mrb[12].mxu0 }
 0x1cb   :  { %v1022_v1 = vadd.f32 %v1167_v6, %v1006_v63  ;;  %v671_v4 = vpop.f32.mrb[13].mxu0 }
 0x1cc   :  { %v1020_v11 = vadd.f32 %v1004_v42, %v671_v4  ;;  %v1168_v21 = vpop.f32.mrb[14].mxu0 }
 0x1cd   :  { %1038 = vst [vmem:[#allocation3 + $0x70] sm:$0xff] %v1022_v1  ;;  %v1023_v62 = vadd.f32 %v1168_v21, %v1007_v22  ;;  %v674_v29 = vpop.f32.mrb[15].mxu0 }
 0x1ce   :  { %1036 = vst [vmem:[#allocation3 + $0x60] sm:$0xff] %v1020_v11  ;;  %v1021_v52 = vadd.f32 %v1005_v26, %v674_v29 }
 0x1cf   :  { %1039 = vst [vmem:[#allocation3 + $0x78] sm:$0xff] %v1023_v62 }
 0x1d0   :  { %1037 = vst [vmem:[#allocation3 + $0x68] sm:$0xff] %v1021_v52 }
 0x1d1   :  { %1285 = shalt.err (!%p1282_p4)
}
 0x1d2   :  { %s1286_s21 = scalar_lea.hbm %s1849_s5, 2048 }
 0x1d3   :  { %p1287_p5 = scmp.ne.s32.totalorder %s1849_s5, %s1286_s21  ;;  %p1290_p6 = scmp.lt.u32.totalorder %s1286_s21, %s1849_s5 }
 0x1d5   :  { %p1292_p7 = pnand %p1290_p6, %p1287_p5 }
 0x1d7   :  { %1295 = shalt.err (!%p1292_p7)
}
 0x1d8   :  { %s1301_s25 = smov 128   ;;  %s1302_s26 = smov 8  }
 0x1d9   :  { %1051 = dma.vmem_to_hbm [thread:$0]  %s1046_s18, 2048, %s1849_s5, [#allocation4], %s1301_s25, %s1301_s25, %s1302_s26  }
 0x1da   :  { %1296 = dma.done.wait [#allocation4], 2048  }
 0x1db   :  { %1297 = vsyncadd [#allocation4], 4294965248 }
 0x1dc   :  { %1055 = vsyncpa [#allocation4], 1 }

</bundles_post_ra>
